<compile_context>
chip_gen: v7x
topology: tpu7x:2x2x1
jax: 0.10.0
libtpu: 0.0.40
codegen_flags: <defaults>
</compile_context>

<pallas_src>
import functools

import jax
import jax.numpy as jnp
import numpy as np
from jax import lax
from jax.experimental import pallas as pl
from jax.experimental.pallas import tpu as pltpu

_BN_EPS = 1e-5


# ---------------------------------------------------------------------------
# Fused kernel: conv3x3 + BN(train) + ReLU + bilinear upsample
# ---------------------------------------------------------------------------
def _decoder_fused_kernel(xpad_ref, w_ref, gamma_ref, beta_ref, ay_ref, ax_ref,
                          out_ref, *, n, h, w, cin, cout, H, W, eps):
    m = n * h * w

    # ---- 3x3 conv (halo pre-padded in XLA) as 9 accumulating MXU matmuls ----
    # Straight from shifted window views: no im2col staging buffer and no
    # lane-offset masked writes.  The leading-dim merge reshape keeps the
    # channel (lane) axis untouched; the bf16 cast happens after it so the
    # reshape runs on the well-supported f32 layout.  Accumulator stays f32.
    acc = jnp.zeros((m, cout), jnp.float32)
    for ky in range(3):
        for kx in range(3):
            t = 3 * ky + kx
            xwin = xpad_ref[:, ky:ky + h, kx:kx + w, :]          # (n,h,w,cin) f32
            xmat = xwin.reshape(m, cin).astype(jnp.bfloat16)     # MXU operand
            acc = acc + jnp.dot(xmat, w_ref[t],
                                preferred_element_type=jnp.float32)

    # ---- training-mode BatchNorm over the whole batch (two-pass variance) ---
    inv_cnt = 1.0 / m
    mean = jnp.sum(acc, axis=0, keepdims=True) * inv_cnt              # (1,cout)
    centered = acc - mean
    var = jnp.sum(centered * centered, axis=0, keepdims=True) * inv_cnt
    scale = gamma_ref[...] * lax.rsqrt(var + eps)                     # (1,cout)
    y = jnp.maximum(centered * scale + beta_ref[...], 0.0)            # (m,cout)
    y = y.reshape(n, h, w, cout)

    # ---- bilinear upsample (align_corners=True): width then height ----------
    # Two tiny-K contractions per batch element, ordered so the result lands
    # directly as (H, W, cout) with no in-kernel transpose.  Kept in f32: the
    # MXU is idle here and f32 preserves the interpolation weights exactly.
    for b in range(n):
        yb = y[b]                                                     # (h,w,cout)
        # u[Wd, hh, c] = sum_w Ax[Wd, w] * yb[hh, w, c]
        u = lax.dot_general(ax_ref[...], yb, (((1,), (1,)), ((), ())),
                            preferred_element_type=jnp.float32)       # (W,h,cout)
        # z[Hd, Wd, c] = sum_h Ay[Hd, h] * u[Wd, h, c]
        z = lax.dot_general(ay_ref[...], u, (((1,), (1,)), ((), ())),
                            preferred_element_type=jnp.float32)       # (H,W,cout)
        out_ref[b] = z


# ---------------------------------------------------------------------------
# Wrapper
# ---------------------------------------------------------------------------
def _interp_matrix_np(out_size, in_size):
    """Row-stochastic (out, in) bilinear matrix, align_corners=True (numpy)."""
    a = np.zeros((out_size, in_size), np.float32)
    if out_size == 1:
        src = np.zeros((1,), np.float64)
    else:
        src = np.arange(out_size, dtype=np.float64) * (
            (in_size - 1) / (out_size - 1))
    i0 = np.clip(np.floor(src).astype(np.int64), 0, in_size - 1)
    i1 = np.clip(i0 + 1, 0, in_size - 1)
    frac = (src - i0).astype(np.float32)
    rows = np.arange(out_size)
    a[rows, i0] += (1.0 - frac)
    a[rows, i1] += frac
    return a


@jax.jit
def decoder_forward(x_nchw, enc_nchw, w_oihw, gamma, beta):
    """Matches Decoder.forward(x, encoder_features); returns NCHW output."""
    n, cin, h, w = x_nchw.shape
    _, _, H, W = enc_nchw.shape
    cout = w_oihw.shape[0]

    # NCHW -> NHWC; pad the conv halo here (XLA pad) so the kernel never does
    # halo zeroing / sublane-shifted interior stores.
    x_nhwc = jnp.transpose(x_nchw, (0, 2, 3, 1)).astype(jnp.float32)
    x_pad = jnp.pad(x_nhwc, ((0, 0), (1, 1), (1, 1), (0, 0)))

    # OIHW -> (tap, cin, cout) with tap = 3*ky + kx (matches kernel order);
    # bf16 for the MXU (conv bias fused away by train-mode BN, see header).
    w_taps = jnp.transpose(w_oihw, (2, 3, 1, 0)).astype(
        jnp.bfloat16).reshape(9, cin, cout)

    # Interpolation matrices depend only on static shapes -> numpy, baked as
    # jit constants (no eager scatter builds on the host path).
    ay = jnp.asarray(_interp_matrix_np(H, h))      # (H, h) f32
    ax = jnp.asarray(_interp_matrix_np(W, w))      # (W, w) f32

    y_up = pl.pallas_call(
        functools.partial(_decoder_fused_kernel, n=n, h=h, w=w, cin=cin,
                          cout=cout, H=H, W=W, eps=_BN_EPS),
        grid_spec=pltpu.PrefetchScalarGridSpec(
            num_scalar_prefetch=0,
            grid=(1,),      # whole batch per step at these sizes (review #3)
            in_specs=[
                pl.BlockSpec((n, h + 2, w + 2, cin), lambda i: (0, 0, 0, 0)),
                pl.BlockSpec((9, cin, cout), lambda i: (0, 0, 0)),
                pl.BlockSpec((1, cout), lambda i: (0, 0)),
                pl.BlockSpec((1, cout), lambda i: (0, 0)),
                pl.BlockSpec((H, h), lambda i: (0, 0)),
                pl.BlockSpec((W, w), lambda i: (0, 0)),
            ],
            out_specs=pl.BlockSpec((n, H, W, cout), lambda i: (0, 0, 0, 0)),
        ),
        out_shape=jax.ShapeDtypeStruct((n, H, W, cout), jnp.float32),
        compiler_params=pltpu.CompilerParams(
            dimension_semantics=("arbitrary",)),
    )(x_pad, w_taps,
      gamma.astype(jnp.float32).reshape(1, cout),
      beta.astype(jnp.float32).reshape(1, cout),
      ay, ax)

    # Channel concat with encoder features is pure data movement: done in XLA
    # so the encoder tensor never streams through the kernel.
    y_nchw = jnp.transpose(y_up, (0, 3, 1, 2))
    return jnp.concatenate([enc_nchw.astype(jnp.float32), y_nchw], axis=1)


# ---------------------------------------------------------------------------
# Pure-JAX f32 reference (same semantics as the PyTorch module, train-mode BN)
# ---------------------------------------------------------------------------
def _reference(x_nchw, enc_nchw, w_oihw, gamma, beta, eps=_BN_EPS):
    conv = lax.conv_general_dilated(
        x_nchw.astype(jnp.float32), w_oihw.astype(jnp.float32),
        window_strides=(1, 1), padding=((1, 1), (1, 1)),
        dimension_numbers=('NCHW', 'OIHW', 'NCHW'))
    mean = jnp.mean(conv, axis=(0, 2, 3), keepdims=True)
    var = jnp.mean((conv - mean) ** 2, axis=(0, 2, 3), keepdims=True)
    y = (conv - mean) * lax.rsqrt(var + eps)
    y = y * gamma.reshape(1, -1, 1, 1) + beta.reshape(1, -1, 1, 1)
    y = jnp.maximum(y, 0.0)
    H, W = enc_nchw.shape[2], enc_nchw.shape[3]
    ay = jnp.asarray(_interp_matrix_np(H, y.shape[2]))
    ax = jnp.asarray(_interp_matrix_np(W, y.shape[3]))
    y = jnp.einsum('Hh,nchw->ncHw', ay, y)
    y = jnp.einsum('Ww,ncHw->ncHW', ax, y)
    return jnp.concatenate([enc_nchw.astype(jnp.float32), y], axis=1)


if __name__ == "__main__":
    key = jax.random.PRNGKey(0)
    k1, k2, k3, k4, k5 = jax.random.split(key, 5)

    in_channels = 16
    squeeze_channels = 32
    enc_channels = 8
    N, hx, wx = 2, 8, 8          # decoder input spatial size
    H, W = 16, 16                # encoder feature spatial size (upsample target)

    x = jax.random.normal(k1, (N, in_channels, hx, wx), jnp.float32)
    encoder_features = jax.random.normal(k2, (N, enc_channels, H, W),
                                         jnp.float32)
    w_conv = 0.1 * jax.random.normal(
        k3, (squeeze_channels, in_channels, 3, 3), jnp.float32)
    gamma = 1.0 + 0.1 * jax.random.normal(k4, (squeeze_channels,), jnp.float32)
    beta = 0.1 * jax.random.normal(k5, (squeeze_channels,), jnp.float32)

    out = jax.block_until_ready(
        decoder_forward(x, encoder_features, w_conv, gamma, beta))
    ref = jax.block_until_ready(
        _reference(x, encoder_features, w_conv, gamma, beta))

    assert out.shape == (N, enc_channels + squeeze_channels, H, W), out.shape
    # Conv MXU operands are bf16 (f32 accumulation), so the comparison against
    # the f32 reference tolerates ~1e-2-level deviations; BN outputs are O(1),
    # so 3e-2 abs/rel still catches any structural error.
    np.testing.assert_allclose(np.asarray(out), np.asarray(ref),
                               rtol=3e-2, atol=3e-2)
    print("KERNEL_OK")
</pallas_src>

<mosaic_0001>
module attributes {stable_mosaic.version = 11 : i64} {
  func.func @_decoder_fused_kernel(%arg0: i32, %arg1: memref<2x10x10x16xf32, #tpu.memory_space<vmem>>, %arg2: memref<9x16x32xbf16, #tpu.memory_space<vmem>>, %arg3: memref<1x32xf32, #tpu.memory_space<vmem>>, %arg4: memref<1x32xf32, #tpu.memory_space<vmem>>, %arg5: memref<16x8xf32, #tpu.memory_space<vmem>>, %arg6: memref<16x8xf32, #tpu.memory_space<vmem>>, %arg7: memref<2x16x16x32xf32, #tpu.memory_space<vmem>>) attributes {dimension_semantics = [#tpu.dimension_semantics<arbitrary>], iteration_bounds = array<i64: 1>, scalar_prefetch = 0 : i64, scratch_operands = 0 : i64, tpu.core_type = #tpu.core_type<tc>, window_params = [{pipeline_mode = #tpu.pipeline_mode<synchronous>, transform_indices = @transform_0, window_bounds = array<i64: 2, 10, 10, 16>}, {pipeline_mode = #tpu.pipeline_mode<synchronous>, transform_indices = @transform_1, window_bounds = array<i64: 9, 16, 32>}, {pipeline_mode = #tpu.pipeline_mode<synchronous>, transform_indices = @transform_2, window_bounds = array<i64: 1, 32>}, {pipeline_mode = #tpu.pipeline_mode<synchronous>, transform_indices = @transform_3, window_bounds = array<i64: 1, 32>}, {pipeline_mode = #tpu.pipeline_mode<synchronous>, transform_indices = @transform_4, window_bounds = array<i64: 16, 8>}, {pipeline_mode = #tpu.pipeline_mode<synchronous>, transform_indices = @transform_5, window_bounds = array<i64: 16, 8>}, {pipeline_mode = #tpu.pipeline_mode<synchronous>, transform_indices = @transform_6, window_bounds = array<i64: 2, 16, 16, 32>}]} {
    %cst = arith.constant 0.000000e+00 : f32
    %0 = vector.broadcast %cst : f32 to vector<128x32xf32>
    %c0 = arith.constant 0 : index
    %c0_0 = arith.constant 0 : index
    %c0_1 = arith.constant 0 : index
    %c0_2 = arith.constant 0 : index
    %1 = vector.load %arg1[%c0, %c0_0, %c0_1, %c0_2] : memref<2x10x10x16xf32, #tpu.memory_space<vmem>>, vector<2x8x8x16xf32>
    %2 = vector.shape_cast %1 : vector<2x8x8x16xf32> to vector<128x16xf32>
    %3 = arith.truncf %2 : vector<128x16xf32> to vector<128x16xbf16>
    %c0_3 = arith.constant 0 : index
    %c0_4 = arith.constant 0 : index
    %c0_5 = arith.constant 0 : index
    %4 = vector.load %arg2[%c0_3, %c0_4, %c0_5] : memref<9x16x32xbf16, #tpu.memory_space<vmem>>, vector<1x16x32xbf16>
    %5 = vector.shape_cast %4 : vector<1x16x32xbf16> to vector<16x32xbf16>
    %cst_6 = arith.constant dense<0.000000e+00> : vector<128x32xf32>
    %6 = tpu.matmul %3, %5, %cst_6 {dimension_numbers = #tpu.dot_dimension_numbers<[1], [0], [0], [1], [0, 0, 1, 1], [], []>} : vector<128x16xbf16>, vector<16x32xbf16>, vector<128x32xf32> -> vector<128x32xf32>
    %7 = arith.addf %0, %6 : vector<128x32xf32>
    %c0_7 = arith.constant 0 : index
    %c0_8 = arith.constant 0 : index
    %c1 = arith.constant 1 : index
    %c0_9 = arith.constant 0 : index
    %8 = vector.load %arg1[%c0_7, %c0_8, %c1, %c0_9] : memref<2x10x10x16xf32, #tpu.memory_space<vmem>>, vector<2x8x8x16xf32>
    %9 = vector.shape_cast %8 : vector<2x8x8x16xf32> to vector<128x16xf32>
    %10 = arith.truncf %9 : vector<128x16xf32> to vector<128x16xbf16>
    %c1_10 = arith.constant 1 : index
    %c0_11 = arith.constant 0 : index
    %c0_12 = arith.constant 0 : index
    %11 = vector.load %arg2[%c1_10, %c0_11, %c0_12] : memref<9x16x32xbf16, #tpu.memory_space<vmem>>, vector<1x16x32xbf16>
    %12 = vector.shape_cast %11 : vector<1x16x32xbf16> to vector<16x32xbf16>
    %cst_13 = arith.constant dense<0.000000e+00> : vector<128x32xf32>
    %13 = tpu.matmul %10, %12, %cst_13 {dimension_numbers = #tpu.dot_dimension_numbers<[1], [0], [0], [1], [0, 0, 1, 1], [], []>} : vector<128x16xbf16>, vector<16x32xbf16>, vector<128x32xf32> -> vector<128x32xf32>
    %14 = arith.addf %7, %13 : vector<128x32xf32>
    %c0_14 = arith.constant 0 : index
    %c0_15 = arith.constant 0 : index
    %c2 = arith.constant 2 : index
    %c0_16 = arith.constant 0 : index
    %15 = vector.load %arg1[%c0_14, %c0_15, %c2, %c0_16] : memref<2x10x10x16xf32, #tpu.memory_space<vmem>>, vector<2x8x8x16xf32>
    %16 = vector.shape_cast %15 : vector<2x8x8x16xf32> to vector<128x16xf32>
    %17 = arith.truncf %16 : vector<128x16xf32> to vector<128x16xbf16>
    %c2_17 = arith.constant 2 : index
    %c0_18 = arith.constant 0 : index
    %c0_19 = arith.constant 0 : index
    %18 = vector.load %arg2[%c2_17, %c0_18, %c0_19] : memref<9x16x32xbf16, #tpu.memory_space<vmem>>, vector<1x16x32xbf16>
    %19 = vector.shape_cast %18 : vector<1x16x32xbf16> to vector<16x32xbf16>
    %cst_20 = arith.constant dense<0.000000e+00> : vector<128x32xf32>
    %20 = tpu.matmul %17, %19, %cst_20 {dimension_numbers = #tpu.dot_dimension_numbers<[1], [0], [0], [1], [0, 0, 1, 1], [], []>} : vector<128x16xbf16>, vector<16x32xbf16>, vector<128x32xf32> -> vector<128x32xf32>
    %21 = arith.addf %14, %20 : vector<128x32xf32>
    %c0_21 = arith.constant 0 : index
    %c1_22 = arith.constant 1 : index
    %c0_23 = arith.constant 0 : index
    %c0_24 = arith.constant 0 : index
    %22 = vector.load %arg1[%c0_21, %c1_22, %c0_23, %c0_24] : memref<2x10x10x16xf32, #tpu.memory_space<vmem>>, vector<2x8x8x16xf32>
    %23 = vector.shape_cast %22 : vector<2x8x8x16xf32> to vector<128x16xf32>
    %24 = arith.truncf %23 : vector<128x16xf32> to vector<128x16xbf16>
    %c3 = arith.constant 3 : index
    %c0_25 = arith.constant 0 : index
    %c0_26 = arith.constant 0 : index
    %25 = vector.load %arg2[%c3, %c0_25, %c0_26] : memref<9x16x32xbf16, #tpu.memory_space<vmem>>, vector<1x16x32xbf16>
    %26 = vector.shape_cast %25 : vector<1x16x32xbf16> to vector<16x32xbf16>
    %cst_27 = arith.constant dense<0.000000e+00> : vector<128x32xf32>
    %27 = tpu.matmul %24, %26, %cst_27 {dimension_numbers = #tpu.dot_dimension_numbers<[1], [0], [0], [1], [0, 0, 1, 1], [], []>} : vector<128x16xbf16>, vector<16x32xbf16>, vector<128x32xf32> -> vector<128x32xf32>
    %28 = arith.addf %21, %27 : vector<128x32xf32>
    %c0_28 = arith.constant 0 : index
    %c1_29 = arith.constant 1 : index
    %c1_30 = arith.constant 1 : index
    %c0_31 = arith.constant 0 : index
    %29 = vector.load %arg1[%c0_28, %c1_29, %c1_30, %c0_31] : memref<2x10x10x16xf32, #tpu.memory_space<vmem>>, vector<2x8x8x16xf32>
    %30 = vector.shape_cast %29 : vector<2x8x8x16xf32> to vector<128x16xf32>
    %31 = arith.truncf %30 : vector<128x16xf32> to vector<128x16xbf16>
    %c4 = arith.constant 4 : index
    %c0_32 = arith.constant 0 : index
    %c0_33 = arith.constant 0 : index
    %32 = vector.load %arg2[%c4, %c0_32, %c0_33] : memref<9x16x32xbf16, #tpu.memory_space<vmem>>, vector<1x16x32xbf16>
    %33 = vector.shape_cast %32 : vector<1x16x32xbf16> to vector<16x32xbf16>
    %cst_34 = arith.constant dense<0.000000e+00> : vector<128x32xf32>
    %34 = tpu.matmul %31, %33, %cst_34 {dimension_numbers = #tpu.dot_dimension_numbers<[1], [0], [0], [1], [0, 0, 1, 1], [], []>} : vector<128x16xbf16>, vector<16x32xbf16>, vector<128x32xf32> -> vector<128x32xf32>
    %35 = arith.addf %28, %34 : vector<128x32xf32>
    %c0_35 = arith.constant 0 : index
    %c1_36 = arith.constant 1 : index
    %c2_37 = arith.constant 2 : index
    %c0_38 = arith.constant 0 : index
    %36 = vector.load %arg1[%c0_35, %c1_36, %c2_37, %c0_38] : memref<2x10x10x16xf32, #tpu.memory_space<vmem>>, vector<2x8x8x16xf32>
    %37 = vector.shape_cast %36 : vector<2x8x8x16xf32> to vector<128x16xf32>
    %38 = arith.truncf %37 : vector<128x16xf32> to vector<128x16xbf16>
    %c5 = arith.constant 5 : index
    %c0_39 = arith.constant 0 : index
    %c0_40 = arith.constant 0 : index
    %39 = vector.load %arg2[%c5, %c0_39, %c0_40] : memref<9x16x32xbf16, #tpu.memory_space<vmem>>, vector<1x16x32xbf16>
    %40 = vector.shape_cast %39 : vector<1x16x32xbf16> to vector<16x32xbf16>
    %cst_41 = arith.constant dense<0.000000e+00> : vector<128x32xf32>
    %41 = tpu.matmul %38, %40, %cst_41 {dimension_numbers = #tpu.dot_dimension_numbers<[1], [0], [0], [1], [0, 0, 1, 1], [], []>} : vector<128x16xbf16>, vector<16x32xbf16>, vector<128x32xf32> -> vector<128x32xf32>
    %42 = arith.addf %35, %41 : vector<128x32xf32>
    %c0_42 = arith.constant 0 : index
    %c2_43 = arith.constant 2 : index
    %c0_44 = arith.constant 0 : index
    %c0_45 = arith.constant 0 : index
    %43 = vector.load %arg1[%c0_42, %c2_43, %c0_44, %c0_45] : memref<2x10x10x16xf32, #tpu.memory_space<vmem>>, vector<2x8x8x16xf32>
    %44 = vector.shape_cast %43 : vector<2x8x8x16xf32> to vector<128x16xf32>
    %45 = arith.truncf %44 : vector<128x16xf32> to vector<128x16xbf16>
    %c6 = arith.constant 6 : index
    %c0_46 = arith.constant 0 : index
    %c0_47 = arith.constant 0 : index
    %46 = vector.load %arg2[%c6, %c0_46, %c0_47] : memref<9x16x32xbf16, #tpu.memory_space<vmem>>, vector<1x16x32xbf16>
    %47 = vector.shape_cast %46 : vector<1x16x32xbf16> to vector<16x32xbf16>
    %cst_48 = arith.constant dense<0.000000e+00> : vector<128x32xf32>
    %48 = tpu.matmul %45, %47, %cst_48 {dimension_numbers = #tpu.dot_dimension_numbers<[1], [0], [0], [1], [0, 0, 1, 1], [], []>} : vector<128x16xbf16>, vector<16x32xbf16>, vector<128x32xf32> -> vector<128x32xf32>
    %49 = arith.addf %42, %48 : vector<128x32xf32>
    %c0_49 = arith.constant 0 : index
    %c2_50 = arith.constant 2 : index
    %c1_51 = arith.constant 1 : index
    %c0_52 = arith.constant 0 : index
    %50 = vector.load %arg1[%c0_49, %c2_50, %c1_51, %c0_52] : memref<2x10x10x16xf32, #tpu.memory_space<vmem>>, vector<2x8x8x16xf32>
    %51 = vector.shape_cast %50 : vector<2x8x8x16xf32> to vector<128x16xf32>
    %52 = arith.truncf %51 : vector<128x16xf32> to vector<128x16xbf16>
    %c7 = arith.constant 7 : index
    %c0_53 = arith.constant 0 : index
    %c0_54 = arith.constant 0 : index
    %53 = vector.load %arg2[%c7, %c0_53, %c0_54] : memref<9x16x32xbf16, #tpu.memory_space<vmem>>, vector<1x16x32xbf16>
    %54 = vector.shape_cast %53 : vector<1x16x32xbf16> to vector<16x32xbf16>
    %cst_55 = arith.constant dense<0.000000e+00> : vector<128x32xf32>
    %55 = tpu.matmul %52, %54, %cst_55 {dimension_numbers = #tpu.dot_dimension_numbers<[1], [0], [0], [1], [0, 0, 1, 1], [], []>} : vector<128x16xbf16>, vector<16x32xbf16>, vector<128x32xf32> -> vector<128x32xf32>
    %56 = arith.addf %49, %55 : vector<128x32xf32>
    %c0_56 = arith.constant 0 : index
    %c2_57 = arith.constant 2 : index
    %c2_58 = arith.constant 2 : index
    %c0_59 = arith.constant 0 : index
    %57 = vector.load %arg1[%c0_56, %c2_57, %c2_58, %c0_59] : memref<2x10x10x16xf32, #tpu.memory_space<vmem>>, vector<2x8x8x16xf32>
    %58 = vector.shape_cast %57 : vector<2x8x8x16xf32> to vector<128x16xf32>
    %59 = arith.truncf %58 : vector<128x16xf32> to vector<128x16xbf16>
    %c8 = arith.constant 8 : index
    %c0_60 = arith.constant 0 : index
    %c0_61 = arith.constant 0 : index
    %60 = vector.load %arg2[%c8, %c0_60, %c0_61] : memref<9x16x32xbf16, #tpu.memory_space<vmem>>, vector<1x16x32xbf16>
    %61 = vector.shape_cast %60 : vector<1x16x32xbf16> to vector<16x32xbf16>
    %cst_62 = arith.constant dense<0.000000e+00> : vector<128x32xf32>
    %62 = tpu.matmul %59, %61, %cst_62 {dimension_numbers = #tpu.dot_dimension_numbers<[1], [0], [0], [1], [0, 0, 1, 1], [], []>} : vector<128x16xbf16>, vector<16x32xbf16>, vector<128x32xf32> -> vector<128x32xf32>
    %63 = arith.addf %56, %62 : vector<128x32xf32>
    %cst_63 = arith.constant dense<0.000000e+00> : vector<32xf32>
    %64 = vector.multi_reduction <add>, %63, %cst_63 [0] : vector<128x32xf32> to vector<32xf32>
    %65 = vector.shape_cast %64 : vector<32xf32> to vector<1x32xf32>
    %cst_64 = arith.constant 7.812500e-03 : f32
    %66 = vector.broadcast %cst_64 : f32 to vector<1x32xf32>
    %67 = arith.mulf %65, %66 : vector<1x32xf32>
    %68 = vector.broadcast %67 : vector<1x32xf32> to vector<128x32xf32>
    %69 = arith.subf %63, %68 : vector<128x32xf32>
    %70 = arith.mulf %69, %69 : vector<128x32xf32>
    %cst_65 = arith.constant dense<0.000000e+00> : vector<32xf32>
    %71 = vector.multi_reduction <add>, %70, %cst_65 [0] : vector<128x32xf32> to vector<32xf32>
    %72 = vector.shape_cast %71 : vector<32xf32> to vector<1x32xf32>
    %cst_66 = arith.constant 7.812500e-03 : f32
    %73 = vector.broadcast %cst_66 : f32 to vector<1x32xf32>
    %74 = arith.mulf %72, %73 : vector<1x32xf32>
    %c0_67 = arith.constant 0 : index
    %c0_68 = arith.constant 0 : index
    %75 = vector.load %arg3[%c0_67, %c0_68] : memref<1x32xf32, #tpu.memory_space<vmem>>, vector<1x32xf32>
    %cst_69 = arith.constant 9.99999974E-6 : f32
    %76 = vector.broadcast %cst_69 : f32 to vector<1x32xf32>
    %77 = arith.addf %74, %76 : vector<1x32xf32>
    %78 = math.rsqrt %77 : vector<1x32xf32>
    %79 = arith.mulf %75, %78 : vector<1x32xf32>
    %80 = vector.broadcast %79 : vector<1x32xf32> to vector<128x32xf32>
    %81 = arith.mulf %69, %80 : vector<128x32xf32>
    %c0_70 = arith.constant 0 : index
    %c0_71 = arith.constant 0 : index
    %82 = vector.load %arg4[%c0_70, %c0_71] : memref<1x32xf32, #tpu.memory_space<vmem>>, vector<1x32xf32>
    %83 = vector.broadcast %82 : vector<1x32xf32> to vector<128x32xf32>
    %84 = arith.addf %81, %83 : vector<128x32xf32>
    %cst_72 = arith.constant 0.000000e+00 : f32
    %85 = vector.broadcast %cst_72 : f32 to vector<128x32xf32>
    %86 = arith.maximumf %84, %85 : vector<128x32xf32>
    %87 = vector.shape_cast %86 : vector<128x32xf32> to vector<2x8x8x32xf32>
    %88 = vector.extract_strided_slice %87 {offsets = [0, 0, 0, 0], sizes = [1, 8, 8, 32], strides = [1, 1, 1, 1]} : vector<2x8x8x32xf32> to vector<1x8x8x32xf32>
    %89 = vector.shape_cast %88 : vector<1x8x8x32xf32> to vector<8x8x32xf32>
    %c0_73 = arith.constant 0 : index
    %c0_74 = arith.constant 0 : index
    %90 = vector.load %arg6[%c0_73, %c0_74] : memref<16x8xf32, #tpu.memory_space<vmem>>, vector<16x8xf32>
    %cst_75 = arith.constant dense<0.000000e+00> : vector<16x8x32xf32>
    %91 = tpu.matmul %90, %89, %cst_75 {dimension_numbers = #tpu.dot_dimension_numbers<[1], [1], [0], [0, 2], [0, 0, 1, 0, 1, 2], [], []>} : vector<16x8xf32>, vector<8x8x32xf32>, vector<16x8x32xf32> -> vector<16x8x32xf32>
    %c0_76 = arith.constant 0 : index
    %c0_77 = arith.constant 0 : index
    %92 = vector.load %arg5[%c0_76, %c0_77] : memref<16x8xf32, #tpu.memory_space<vmem>>, vector<16x8xf32>
    %cst_78 = arith.constant dense<0.000000e+00> : vector<16x16x32xf32>
    %93 = tpu.matmul %92, %91, %cst_78 {dimension_numbers = #tpu.dot_dimension_numbers<[1], [1], [0], [0, 2], [0, 0, 1, 0, 1, 2], [], []>} : vector<16x8xf32>, vector<16x8x32xf32>, vector<16x16x32xf32> -> vector<16x16x32xf32>
    %c0_79 = arith.constant 0 : index
    %c0_80 = arith.constant 0 : index
    %c0_81 = arith.constant 0 : index
    %c0_82 = arith.constant 0 : index
    %94 = vector.load %arg7[%c0_79, %c0_80, %c0_81, %c0_82] : memref<2x16x16x32xf32, #tpu.memory_space<vmem>>, vector<1x16x16x32xf32>
    %95 = vector.shape_cast %94 : vector<1x16x16x32xf32> to vector<16x16x32xf32>
    %96 = vector.shape_cast %93 : vector<16x16x32xf32> to vector<1x16x16x32xf32>
    tpu.vector_store %arg7[%c0_79, %c0_80, %c0_81, %c0_82], %96 {strides = array<i32>} : memref<2x16x16x32xf32, #tpu.memory_space<vmem>>, vector<1x16x16x32xf32>,
    %97 = vector.extract_strided_slice %87 {offsets = [1, 0, 0, 0], sizes = [1, 8, 8, 32], strides = [1, 1, 1, 1]} : vector<2x8x8x32xf32> to vector<1x8x8x32xf32>
    %98 = vector.shape_cast %97 : vector<1x8x8x32xf32> to vector<8x8x32xf32>
    %c0_83 = arith.constant 0 : index
    %c0_84 = arith.constant 0 : index
    %99 = vector.load %arg6[%c0_83, %c0_84] : memref<16x8xf32, #tpu.memory_space<vmem>>, vector<16x8xf32>
    %cst_85 = arith.constant dense<0.000000e+00> : vector<16x8x32xf32>
    %100 = tpu.matmul %99, %98, %cst_85 {dimension_numbers = #tpu.dot_dimension_numbers<[1], [1], [0], [0, 2], [0, 0, 1, 0, 1, 2], [], []>} : vector<16x8xf32>, vector<8x8x32xf32>, vector<16x8x32xf32> -> vector<16x8x32xf32>
    %c0_86 = arith.constant 0 : index
    %c0_87 = arith.constant 0 : index
    %101 = vector.load %arg5[%c0_86, %c0_87] : memref<16x8xf32, #tpu.memory_space<vmem>>, vector<16x8xf32>
    %cst_88 = arith.constant dense<0.000000e+00> : vector<16x16x32xf32>
    %102 = tpu.matmul %101, %100, %cst_88 {dimension_numbers = #tpu.dot_dimension_numbers<[1], [1], [0], [0, 2], [0, 0, 1, 0, 1, 2], [], []>} : vector<16x8xf32>, vector<16x8x32xf32>, vector<16x16x32xf32> -> vector<16x16x32xf32>
    %c1_89 = arith.constant 1 : index
    %c0_90 = arith.constant 0 : index
    %c0_91 = arith.constant 0 : index
    %c0_92 = arith.constant 0 : index
    %103 = vector.load %arg7[%c1_89, %c0_90, %c0_91, %c0_92] : memref<2x16x16x32xf32, #tpu.memory_space<vmem>>, vector<1x16x16x32xf32>
    %104 = vector.shape_cast %103 : vector<1x16x16x32xf32> to vector<16x16x32xf32>
    %105 = vector.shape_cast %102 : vector<16x16x32xf32> to vector<1x16x16x32xf32>
    tpu.vector_store %arg7[%c1_89, %c0_90, %c0_91, %c0_92], %105 {strides = array<i32>} : memref<2x16x16x32xf32, #tpu.memory_space<vmem>>, vector<1x16x16x32xf32>,
    return
  }
  func.func @transform_0(%arg0: i32) -> (i32, i32, i32, i32) {
    %c0_i32 = arith.constant 0 : i32
    %c0_i32_0 = arith.constant 0 : i32
    %c0_i32_1 = arith.constant 0 : i32
    %c0_i32_2 = arith.constant 0 : i32
    %c0_i32_3 = arith.constant 0 : i32
    return %c0_i32, %c0_i32_0, %c0_i32_1, %c0_i32_2 : i32, i32, i32, i32
  }
  func.func @transform_1(%arg0: i32) -> (i32, i32, i32) {
    %c0_i32 = arith.constant 0 : i32
    %c0_i32_0 = arith.constant 0 : i32
    %c0_i32_1 = arith.constant 0 : i32
    %c0_i32_2 = arith.constant 0 : i32
    return %c0_i32, %c0_i32_0, %c0_i32_1 : i32, i32, i32
  }
  func.func @transform_2(%arg0: i32) -> (i32, i32) {
    %c0_i32 = arith.constant 0 : i32
    %c0_i32_0 = arith.constant 0 : i32
    %c0_i32_1 = arith.constant 0 : i32
    return %c0_i32, %c0_i32_0 : i32, i32
  }
  func.func @transform_3(%arg0: i32) -> (i32, i32) {
    %c0_i32 = arith.constant 0 : i32
    %c0_i32_0 = arith.constant 0 : i32
    %c0_i32_1 = arith.constant 0 : i32
    return %c0_i32, %c0_i32_0 : i32, i32
  }
  func.func @transform_4(%arg0: i32) -> (i32, i32) {
    %c0_i32 = arith.constant 0 : i32
    %c0_i32_0 = arith.constant 0 : i32
    %c0_i32_1 = arith.constant 0 : i32
    return %c0_i32, %c0_i32_0 : i32, i32
  }
  func.func @transform_5(%arg0: i32) -> (i32, i32) {
    %c0_i32 = arith.constant 0 : i32
    %c0_i32_0 = arith.constant 0 : i32
    %c0_i32_1 = arith.constant 0 : i32
    return %c0_i32, %c0_i32_0 : i32, i32
  }
  func.func @transform_6(%arg0: i32) -> (i32, i32, i32, i32) {
    %c0_i32 = arith.constant 0 : i32
    %c0_i32_0 = arith.constant 0 : i32
    %c0_i32_1 = arith.constant 0 : i32
    %c0_i32_2 = arith.constant 0 : i32
    %c0_i32_3 = arith.constant 0 : i32
    return %c0_i32, %c0_i32_0, %c0_i32_1, %c0_i32_2 : i32, i32, i32, i32
  }
}

</mosaic_0001>

<bundles_post_ra>
// kernel: decoder_forward.1
= control target key start
LH: loop header
LB: loop body
LE: loop exit
PB: predicated region body
PF: predicated region fallthrough
CT: control target
= control target key end

     0   :  { %vm83_vm0 = vcmask 130048   ;;  %vm1524_vm1 = vcmask 261120   ;;  %s5595_s17 = smov 96   ;;  %vm1997_vm2 = vcmask 523264   ;;  %vm1999_vm3 = vcmask 785408   ;;  %s7380_s1 = inlined_call_operand.vmem [shape: bf16[9,16,32], index: 1, kind: input, shape index: {}]   ;;  %s7381_s0 = inlined_call_operand.vmem [shape: f32[2,10,10,16], index: 0, kind: input, shape index: {}]   ;;  %s7382_s2 = inlined_call_operand.vmem [shape: f32[1,32], index: 2, kind: input, shape index: {}]   ;;  %s7383_s3 = inlined_call_operand.vmem [shape: f32[1,32], index: 3, kind: input, shape index: {}]   ;;  %s7384_s5 = inlined_call_operand.vmem [shape: f32[16,8], index: 5, kind: input, shape index: {}, may-alias: {4,5}]   ;;  %s7385_s4 = inlined_call_operand.vmem [shape: f32[16,8], index: 4, kind: input, shape index: {}, may-alias: {4,5}]   ;;  %s7386_s6 = inlined_call_operand.vmem [shape: f32[2,16,16,32], index: 6, kind: output, shape index: {}]  }
   0x1   :  { %v5579_v0 = vld [vmem:[%s7380_s1 + $0x8] sm:$0xff]   ;;  %v5637_v1 = vld [vmem:[%s7380_s1 + $0x18] sm:$0xff]   ;;  %v5648_v4 = vld [vmem:[%s7381_s0 + $0x10] sm:$0xff]  ;;  %vm2090_vm4 = vcmask 64512  }
   0x2   :  { %5281 = vmatprep.subr.bf16.mxu1 %v5579_v0  ;;  %v50_v2 = vld [vmem:[%s7381_s0 + $0x1] sm:$0xff]  ;;  %v51_v3 = vld [vmem:[%s7381_s0 + $0x11] sm:$0xff]  ;;  %5335 = vmatprep.subr.bf16.mxu0 %v5637_v1 }
   0x3   :  { %5282 = vmatpush3.bf16.msra.mxu1 %v5579_v0  ;;  %v66_v5 = vpack.c.bf16 %v51_v3, %v50_v2  ;;  %v5654_v6 = vld [vmem:[%s7381_s0 + $0x20] sm:$0xff]  ;;  %v53_v8 = vld [vmem:[%s7381_s0 + $0x31] sm:$0xff]  ;;  %5336 = vmatpush3.bf16.msra.mxu0 %v5637_v1  ;;  %v5583_v26 = vld [vmem:[%s7380_s1 + $0x28] sm:$0xff]  }
   0x4   :  { %v52_v7 = vld [vmem:[%s7381_s0 + $0x21] sm:$0xff]  ;;  %v519_v9 = vpack.c.bf16 %v5654_v6, %v5648_v4  ;;  %v5670_v11 = vld [vmem:[%s7381_s0 + $0x30] sm:$0xff] }
   0x5   :  { %v5665_v10 = vpack.c.bf16 %v53_v8, %v52_v7  ;;  %v5675_v12 = vld [vmem:[%s7381_s0 + $0x40] sm:$0xff]  ;;  %5283 = vmatprep.mubr.msk.bf16.mxu1 %vm83_vm0, %v66_v5  ;;  %v55_v15 = vld [vmem:[%s7381_s0 + $0x51] sm:$0xff]  ;;  %v689_v16 = vpack.c.bf16 %v52_v7, %v51_v3  ;;  %v5813_v56 = vpack.c.bf16 %v5670_v11, %v5654_v6 }
   0x6   :  { %v54_v13 = vld [vmem:[%s7381_s0 + $0x41] sm:$0xff]  ;;  %v520_v14 = vpack.c.bf16 %v5675_v12, %v5670_v11  ;;  %5337 = vmatprep.mubr.msk.bf16.mxu0 %vm83_vm0, %v519_v9  ;;  %v57_v20 = vld [vmem:[%s7381_s0 + $0x71] sm:$0xff] }
   0x7   :  { %5284 = vmatmul.mubr.msk.bf16.vlgmr.msra.gmra.mrb[0].mxu1 %vm83_vm0, %v5665_v10  ;;  %v5689_v17 = vpack.c.bf16 %v55_v15, %v54_v13  ;;  %v5581_v18 = vld [vmem:[%s7380_s1 + $0x20] sm:$0xff]   ;;  %v59_v22 = vld [vmem:[%s7381_s0 + $0xb1] sm:$0xff]  ;;  %v690_v27 = vpack.c.bf16 %v54_v13, %v53_v8 }
   0x8   :  { %5338 = vmatmul.mubr.msk.bf16.vlgmr.msra.gmra.mrb[0].mxu0 %vm83_vm0, %v520_v14  ;;  %v56_v19 = vld [vmem:[%s7381_s0 + $0x61] sm:$0xff]  ;;  %5353 = vmatprep.subr.bf16.mxu0 %v5581_v18  ;;  %v61_v29 = vld [vmem:[%s7381_s0 + $0xd1] sm:$0xff] }
   0x9   :  { %5287 = vmatprep.mubr.msk.bf16.mxu1 %vm83_vm0, %v5689_v17  ;;  %v58_v21 = vld [vmem:[%s7381_s0 + $0xa1] sm:$0xff]  ;;  %5354 = vmatpush3.bf16.msra.mxu0 %v5581_v18  ;;  %v5710_v23 = vpack.c.bf16 %v57_v20, %v56_v19  ;;  %v691_v30 = vpack.c.bf16 %v56_v19, %v55_v15  ;;  %v63_v32 = vld [vmem:[%s7381_s0 + $0xf1] sm:$0xff] }
   0xa   :  { %5355 = vmatprep.mubr.msk.bf16.mxu0 %vm83_vm0, %v689_v16  ;;  %v5582_v24 = vld [vmem:[%s7380_s1] sm:$0xff]   ;;  %v70_v25 = vpack.c.bf16 %v59_v22, %v58_v21  ;;  %5371 = vmatprep.subr.bf16.mxu0 %v5583_v26  ;;  %v5584_v36 = vld [vmem:[%s7380_s1 + $0x10] sm:$0xff]  }
   0xb   :  { %5299 = vmatprep.subr.bf16.mxu1 %v5582_v24  ;;  %v60_v28 = vld [vmem:[%s7381_s0 + $0xc1] sm:$0xff]  ;;  %v5752_v37 = vld [vmem:[%s7380_s1 + $0x30] sm:$0xff]  }
   0xc   :  { %5300 = vmatpush3.bf16.msra.mxu1 %v5582_v24  ;;  %v62_v31 = vld [vmem:[%s7381_s0 + $0xe1] sm:$0xff]  ;;  %v5733_v33 = vpack.c.bf16 %v61_v29, %v60_v28  ;;  %v65_v40 = vld [vmem:[%s7381_s0 + $0x111] sm:$0xff]  ;;  %v693_v41 = vpack.c.bf16 %v60_v28, %v59_v22 }
   0xd   :  { %v5736_v34 = vpack.c.bf16 %v63_v32, %v62_v31  ;;  %v5742_v35 = vld [vmem:[%s7381_s0 + $0x81] sm:$0xff]  ;;  %5317 = vmatprep.subr.bf16.mxu1 %v5584_v36  ;;  %v5772_v44 = vld [vmem:[%s7381_s0 + $0x91] sm:$0xff]  ;;  %v694_v53 = vpack.c.bf16 %v62_v31, %v61_v29 }
   0xe   :  { %v692_v38 = vpack.c.bf16 %v5742_v35, %v57_v20  ;;  %v64_v39 = vld [vmem:[%s7381_s0 + $0x101] sm:$0xff]  ;;  %v1203_v47 = vpack.c.bf16 %v5772_v44, %v5742_v35  ;;  %v5792_v49 = vld [vmem:[%s7381_s0 + $0x131] sm:$0xff] }
   0xf   :  { %5288 = vmatmul.mubr.msk.bf16.gmra.mrb[4].mxu1 %vm83_vm0, %v5710_v23  ;;  %v24_v42 = vld [vmem:[%s7381_s0] sm:$0xff]  ;;  %v5767_v43 = vpack.c.bf16 %v65_v40, %v64_v39  ;;  %v5797_v50 = vld [vmem:[%s7381_s0 + $0x92] sm:$0xff]  ;;  %v695_v54 = vpack.c.bf16 %v64_v39, %v63_v32 }
  0x10   :  { %5291 = vmatprep.mubr.msk.bf16.mxu1 %vm83_vm0, %v70_v25  ;;  %v40_v45 = vpack.c.bf16 %v5648_v4, %v24_v42  ;;  %v5779_v46 = vld [vmem:[%s7381_s0 + $0x121] sm:$0xff]  ;;  %v5809_v55 = vld [vmem:[%s7381_s0 + $0x50] sm:$0xff]  ;;  %v5586_v20 = vld [vmem:[%s7380_s1 + $0x38] sm:$0xff]  }
  0x11   :  { %v5787_v48 = vld [vmem:[%s7381_s0 + $0x82] sm:$0xff]  ;;  %v1207_v51 = vpack.c.bf16 %v5792_v49, %v5779_v46  ;;  %v5818_v57 = vpack.c.bf16 %v5809_v55, %v5675_v12  ;;  %v5829_v59 = vld [vmem:[%s7381_s0 + $0x132] sm:$0xff]  ;;  %v696_v63 = vpack.c.bf16 %v5779_v46, %v65_v40 }
  0x12   :  { %v1373_v52 = vpack.c.bf16 %v5797_v50, %v5787_v48  ;;  %v5824_v58 = vld [vmem:[%s7381_s0 + $0x122] sm:$0xff]  ;;  %v5031_v60 = vld [vmem:[%s7381_s0 + $0x12] sm:$0xff] }
  0x13   :  { %v5032_v61 = vld [vmem:[%s7381_s0 + $0x22] sm:$0xff]  ;;  %v1377_v62 = vpack.c.bf16 %v5829_v59, %v5824_v58  ;;  %v5852_v2 = vld [vmem:[%s7381_s0 + $0x70] sm:$0xff] }
  0x14   :  { %5356 = vmatmul.mubr.msk.bf16.vlgmr.msra.gmra.mrb[0].mxu0 %vm83_vm0, %v690_v27  ;;  %v5847_v0 = vld [vmem:[%s7381_s0 + $0x60] sm:$0xff]  ;;  %v859_v3 = vpack.c.bf16 %v5032_v61, %v5031_v60  ;;  %v5860_v5 = vld [vmem:[%s7381_s0 + $0xb0] sm:$0xff] }
  0x15   :  { %5359 = vmatprep.mubr.msk.bf16.mxu0 %vm83_vm0, %v691_v30  ;;  %5372 = vmatpush3.bf16.msra.mxu0 %v5583_v26  ;;  %v32_v4 = vld [vmem:[%s7381_s0 + $0xa0] sm:$0xff]  ;;  %v5865_v6 = vpack.c.bf16 %v5852_v2, %v5847_v0  ;;  %v5033_v8 = vld [vmem:[%s7381_s0 + $0x32] sm:$0xff] }
  0x16   :  { %5389 = vmatprep.subr.bf16.mxu0 %v5752_v37  ;;  %v44_v7 = vpack.c.bf16 %v5860_v5, %v32_v4  ;;  %v5034_v9 = vld [vmem:[%s7381_s0 + $0x42] sm:$0xff]  ;;  %v5035_v11 = vld [vmem:[%s7381_s0 + $0x52] sm:$0xff] }
  0x17   :  { %5292 = vmatmul.mubr.msk.bf16.gmra.mrb[8].mxu1 %vm83_vm0, %v5733_v33  ;;  %v5036_v12 = vld [vmem:[%s7381_s0 + $0x62] sm:$0xff]  ;;  %v860_v13 = vpack.c.bf16 %v5034_v9, %v5033_v8  ;;  %v5893_v15 = vld [vmem:[%s7381_s0 + $0xd0] sm:$0xff] }
  0x18   :  { %5295 = vmatprep.mubr.msk.bf16.mxu1 %vm83_vm0, %v5736_v34  ;;  %v5888_v14 = vld [vmem:[%s7381_s0 + $0xc0] sm:$0xff]  ;;  %v861_v16 = vpack.c.bf16 %v5036_v12, %v5035_v11  ;;  %v5903_v19 = vld [vmem:[%s7381_s0 + $0xf0] sm:$0xff] }
  0x19   :  { %v5898_v18 = vld [vmem:[%s7381_s0 + $0xe0] sm:$0xff]  ;;  %v45_v21 = vpack.c.bf16 %v5893_v15, %v5888_v14  ;;  %v5037_v24 = vld [vmem:[%s7381_s0 + $0x72] sm:$0xff] }
  0x1a   :  { %v46_v22 = vpack.c.bf16 %v5903_v19, %v5898_v18  ;;  %v5039_v25 = vld [vmem:[%s7381_s0 + $0xb2] sm:$0xff]  ;;  %v5040_v26 = vld [vmem:[%s7381_s0 + $0xc2] sm:$0xff]  ;;  %v862_v27 = vpack.c.bf16 %v5787_v48, %v5037_v24 }
  0x1b   :  { %v5930_v28 = vld [vmem:[%s7381_s0 + $0x100] sm:$0xff]  ;;  %v5935_v29 = vld [vmem:[%s7381_s0 + $0x110] sm:$0xff]  ;;  %v863_v30 = vpack.c.bf16 %v5040_v26, %v5039_v25 }
  0x1c   :  { %5360 = vmatmul.mubr.msk.bf16.gmra.mrb[4].mxu0 %vm83_vm0, %v692_v38  ;;  %v332_v31 = vld [vmem:[%s7381_s0 + $0x2] sm:$0xff]  ;;  %v47_v32 = vpack.c.bf16 %v5935_v29, %v5930_v28  ;;  %v5043_v39 = vld [vmem:[%s7381_s0 + $0xf2] sm:$0xff] }
  0x1d   :  { %5363 = vmatprep.mubr.msk.bf16.mxu0 %vm83_vm0, %v693_v41  ;;  %v5042_v38 = vld [vmem:[%s7381_s0 + $0xe2] sm:$0xff] }
  0x1e   :  { %v5044_v40 = vld [vmem:[%s7381_s0 + $0x102] sm:$0xff] }
  0x1f   :  { %5296 = vmatmul.mubr.msk.bf16.gmra.mrb[12].mxu1 %vm83_vm0, %v5767_v43  ;;  %v865_v42 = vpack.c.bf16 %v5044_v40, %v5043_v39  ;;  %v5587_v4 = vld [vmem:[%s7380_s1 + $0x40] sm:$0xff]  }
  0x20   :  { %5301 = vmatprep.mubr.msk.bf16.mxu1 %vm83_vm0, %v40_v45  ;;  %v349_v45 = vpack.c.bf16 %v5033_v8, %v5032_v61  ;;  %v340_v61 = vld [vmem:[%s7381_s0 + $0xa2] sm:$0xff]  ;;  %v5065_v8 = vld [vmem:[%s7381_s0 + $0x90] sm:$0xff] }
  0x24   :  { %5364 = vmatmul.mubr.msk.bf16.gmra.mrb[8].mxu0 %vm83_vm0, %v694_v53  ;;  %v350_v53 = vpack.c.bf16 %v5035_v11, %v5034_v9 }
  0x25   :  { %5367 = vmatprep.mubr.msk.bf16.mxu0 %vm83_vm0, %v695_v54  ;;  %v5045_v54 = vld [vmem:[%s7381_s0 + $0x112] sm:$0xff] }
  0x27   :  { %5302 = vmatmul.mubr.msk.bf16.vlgmr.msra.gmra.mrb[0].mxu1 %vm83_vm0, %v5813_v56 }
  0x28   :  { %5305 = vmatprep.mubr.msk.bf16.mxu1 %vm83_vm0, %v5818_v57  ;;  %5318 = vmatpush3.bf16.msra.mxu1 %v5584_v36  ;;  %v348_v36 = vpack.c.bf16 %v5031_v60, %v332_v31  ;;  %v866_v60 = vpack.c.bf16 %v5824_v58, %v5045_v54 }
  0x29   :  { %5443 = vmatprep.subr.bf16.mxu1 %v5637_v1 }
  0x2c   :  { %5368 = vmatmul.mubr.msk.bf16.gmra.mrb[12].mxu0 %vm83_vm0, %v696_v63  ;;  %v351_v63 = vpack.c.bf16 %v5037_v24, %v5036_v12  ;;  %v523_v12 = vpack.c.bf16 %v5888_v14, %v5860_v5  ;;  %v525_v5 = vpack.c.bf16 %v5930_v28, %v5903_v19 }
  0x2d   :  { %5373 = vmatprep.mubr.msk.bf16.mxu0 %vm83_vm0, %v859_v3  ;;  %v352_v3 = vpack.c.bf16 %v5039_v25, %v340_v61 }
  0x2f   :  { %5306 = vmatmul.mubr.msk.bf16.gmra.mrb[4].mxu1 %vm83_vm0, %v5865_v6 }
  0x30   :  { %5309 = vmatprep.mubr.msk.bf16.mxu1 %vm83_vm0, %v44_v7  ;;  %v354_v7 = vpack.c.bf16 %v5043_v39, %v5042_v38 }
  0x34   :  { %5374 = vmatmul.mubr.msk.bf16.vlgmr.msra.gmra.mrb[0].mxu0 %vm83_vm0, %v860_v13  ;;  %v5072_v13 = vld [vmem:[%s7381_s0 + $0x120] sm:$0xff] }
  0x35   :  { %5377 = vmatprep.mubr.msk.bf16.mxu0 %vm83_vm0, %v861_v16  ;;  %5390 = vmatpush3.bf16.msra.mxu0 %v5752_v37  ;;  %v5041_v37 = vld [vmem:[%s7381_s0 + $0xd2] sm:$0xff]  ;;  %v526_v14 = vpack.c.bf16 %v5072_v13, %v5935_v29 }
  0x36   :  { %5407 = vmatprep.subr.bf16.mxu0 %v5586_v20  ;;  %v864_v41 = vpack.c.bf16 %v5042_v38, %v5041_v37 }
  0x37   :  { %5310 = vmatmul.mubr.msk.bf16.gmra.mrb[8].mxu1 %vm83_vm0, %v45_v21 }
  0x38   :  { %5313 = vmatprep.mubr.msk.bf16.mxu1 %vm83_vm0, %v46_v22 }
  0x3c   :  { %5378 = vmatmul.mubr.msk.bf16.gmra.mrb[4].mxu0 %vm83_vm0, %v862_v27 }
  0x3d   :  { %5381 = vmatprep.mubr.msk.bf16.mxu0 %vm83_vm0, %v863_v30 }
  0x3f   :  { %5314 = vmatmul.mubr.msk.bf16.gmra.mrb[12].mxu1 %vm83_vm0, %v47_v32 }
  0x40   :  { %5319 = vmatprep.mubr.msk.bf16.mxu1 %vm83_vm0, %v348_v36 }
  0x44   :  { %5382 = vmatmul.mubr.msk.bf16.gmra.mrb[8].mxu0 %vm83_vm0, %v864_v41 }
  0x45   :  { %5385 = vmatprep.mubr.msk.bf16.mxu0 %vm83_vm0, %v865_v42 }
  0x47   :  { %5320 = vmatmul.mubr.msk.bf16.vlgmr.msra.gmra.mrb[0].mxu1 %vm83_vm0, %v349_v45 }
  0x48   :  { %5323 = vmatprep.mubr.msk.bf16.mxu1 %vm83_vm0, %v350_v53  ;;  %5444 = vmatpush3.bf16.msra.mxu1 %v5637_v1  ;;  %v353_v1 = vpack.c.bf16 %v5041_v37, %v5040_v26 }
  0x4c   :  { %5386 = vmatmul.mubr.msk.bf16.gmra.mrb[12].mxu0 %vm83_vm0, %v866_v60 }
  0x4d   :  { %5391 = vmatprep.mubr.msk.bf16.mxu0 %vm83_vm0, %v5813_v56  ;;  %v5064_v56 = vld [vmem:[%s7381_s0 + $0x80] sm:$0xff] }
  0x4e   :  { %v1033_v9 = vpack.c.bf16 %v5065_v8, %v5064_v56  ;;  %v522_v11 = vpack.c.bf16 %v5064_v56, %v5852_v2  ;;  %v524_v2 = vpack.c.bf16 %v5898_v18, %v5893_v15 }
  0x4f   :  { %5324 = vmatmul.mubr.msk.bf16.gmra.mrb[4].mxu1 %vm83_vm0, %v351_v63 }
  0x50   :  { %5327 = vmatprep.mubr.msk.bf16.mxu1 %vm83_vm0, %v352_v3 }
  0x54   :  { %5392 = vmatmul.mubr.msk.bf16.vlgmr.msra.gmra.mrb[0].mxu0 %vm83_vm0, %v5818_v57  ;;  %v355_v57 = vpack.c.bf16 %v5045_v54, %v5044_v40 }
  0x55   :  { %5395 = vmatprep.mubr.msk.bf16.mxu0 %vm83_vm0, %v5865_v6  ;;  %5408 = vmatpush3.bf16.msra.mxu0 %v5586_v20  ;;  %v521_v6 = vpack.c.bf16 %v5847_v0, %v5809_v55  ;;  %v5073_v55 = vld [vmem:[%s7381_s0 + $0x130] sm:$0xff] }
  0x56   :  { %5425 = vmatprep.subr.bf16.mxu0 %v5587_v4  ;;  %v1037_v0 = vpack.c.bf16 %v5073_v55, %v5072_v13 }
  0x57   :  { %5328 = vmatmul.mubr.msk.bf16.gmra.mrb[8].mxu1 %vm83_vm0, %v353_v1 }
  0x58   :  { %5331 = vmatprep.mubr.msk.bf16.mxu1 %vm83_vm0, %v354_v7 }
  0x5c   :  { %5396 = vmatmul.mubr.msk.bf16.gmra.mrb[4].mxu0 %vm83_vm0, %v1033_v9 }
  0x5d   :  { %5399 = vmatprep.mubr.msk.bf16.mxu0 %vm83_vm0, %v45_v21 }
  0x5f   :  { %5332 = vmatmul.mubr.msk.bf16.gmra.mrb[12].mxu1 %vm83_vm0, %v355_v57 }
  0x60   :  { %5341 = vmatprep.mubr.msk.bf16.mxu1 %vm83_vm0, %v521_v6 }
  0x64   :  { %5400 = vmatmul.mubr.msk.bf16.gmra.mrb[8].mxu0 %vm83_vm0, %v46_v22 }
  0x65   :  { %5403 = vmatprep.mubr.msk.bf16.mxu0 %vm83_vm0, %v47_v32 }
  0x67   :  { %5342 = vmatmul.mubr.msk.bf16.vlgmr.msra.gmra.mrb[4].mxu1 %vm83_vm0, %v522_v11 }
  0x68   :  { %5345 = vmatprep.mubr.msk.bf16.mxu1 %vm83_vm0, %v523_v12 }
  0x6c   :  { %5404 = vmatmul.mubr.msk.bf16.gmra.mrb[12].mxu0 %vm83_vm0, %v1037_v0 }
  0x6d   :  { %5409 = vmatprep.mubr.msk.bf16.mxu0 %vm83_vm0, %v5665_v10 }
  0x6f   :  { %5346 = vmatmul.mubr.msk.bf16.gmra.mrb[8].mxu1 %vm83_vm0, %v524_v2 }
  0x70   :  { %5349 = vmatprep.mubr.msk.bf16.mxu1 %vm83_vm0, %v525_v5 }
  0x74   :  { %5410 = vmatmul.mubr.msk.bf16.vlgmr.msra.gmra.mrb[0].mxu0 %vm83_vm0, %v5689_v17 }
  0x75   :  { %5413 = vmatprep.mubr.msk.bf16.mxu0 %vm83_vm0, %v5710_v23  ;;  %5426 = vmatpush3.bf16.msra.mxu0 %v5587_v4 }
  0x77   :  { %5350 = vmatmul.mubr.msk.bf16.gmra.mrb[12].mxu1 %vm83_vm0, %v526_v14 }
  0x7c   :  { %5414 = vmatmul.mubr.msk.bf16.gmra.mrb[4].mxu0 %vm83_vm0, %v1203_v47 }
  0x7d   :  { %5417 = vmatprep.mubr.msk.bf16.mxu0 %vm83_vm0, %v5733_v33 }
  0x84   :  { %5418 = vmatmul.mubr.msk.bf16.gmra.mrb[8].mxu0 %vm83_vm0, %v5736_v34 }
  0x85   :  { %5421 = vmatprep.mubr.msk.bf16.mxu0 %vm83_vm0, %v5767_v43 }
  0x8c   :  { %5422 = vmatmul.mubr.msk.bf16.gmra.mrb[12].mxu0 %vm83_vm0, %v1207_v51 }
  0x8d   :  { %5427 = vmatprep.mubr.msk.bf16.mxu0 %vm83_vm0, %v349_v45 }
  0x94   :  { %5428 = vmatmul.mubr.msk.bf16.vlgmr.msra.gmra.mrb[0].mxu0 %vm83_vm0, %v350_v53 }
  0x95   :  { %5431 = vmatprep.mubr.msk.bf16.mxu0 %vm83_vm0, %v351_v63 }
  0x9c   :  { %5432 = vmatmul.mubr.msk.bf16.gmra.mrb[4].mxu0 %vm83_vm0, %v1373_v52 }
  0x9d   :  { %5435 = vmatprep.mubr.msk.bf16.mxu0 %vm83_vm0, %v353_v1 }
  0xa4   :  { %5436 = vmatmul.mubr.msk.bf16.gmra.mrb[8].mxu0 %vm83_vm0, %v354_v7 }
  0xa5   :  { %5439 = vmatprep.mubr.msk.bf16.mxu0 %vm83_vm0, %v355_v57 }
  0xac   :  { %5440 = vmatmul.mubr.msk.bf16.gmra.mrb[12].mxu0 %vm83_vm0, %v1377_v62 }
 0x11a   :  { %v5321_v10 = vpop.f32.mrb[0].mxu1 }
 0x11b   :  { %v423_v17 = vpop.f32.mrb[1].mxu1 }
 0x11c   :  { %v5322_v23 = vpop.f32.mrb[2].mxu1 }
 0x11d   :  { %v426_v33 = vpop.f32.mrb[3].mxu1 }
 0x13a   :  { %v5343_v34 = vpop.f32.mrb[4].mxu1 }
 0x13b   :  { %v610_v35 = vpop.f32.mrb[5].mxu1 }
 0x13c   :  { %v5344_v43 = vpop.f32.mrb[6].mxu1 }
 0x13d   :  { %v613_v44 = vpop.f32.mrb[7].mxu1 }
 0x142   :  { %v5347_v46 = vpop.f32.mrb[8].mxu1 }
 0x143   :  { %v626_v47 = vpop.f32.mrb[9].mxu1 }
 0x144   :  { %v5348_v48 = vpop.f32.mrb[10].mxu1 }
 0x145   :  { %v629_v49 = vpop.f32.mrb[11].mxu1 }
 0x14a   :  { %v5351_v50 = vpop.f32.mrb[12].mxu1 }
 0x14b   :  { %v642_v51 = vpop.f32.mrb[13].mxu1 }
 0x14c   :  { %v5352_v52 = vpop.f32.mrb[14].mxu1 }
 0x14d   :  { %v645_v15 = vpop.f32.mrb[15].mxu1 }
 0x167   :  { %v5429_v16 = vpop.f32.mrb[0].mxu0 }
 0x168   :  { %v6052_v58 = vadd.f32 %v5429_v16, %v5321_v10  ;;  %v1445_v59 = vpop.f32.mrb[1].mxu0 }
 0x169   :  { %v6054_v62 = vadd.f32 %v1445_v59, %v423_v17  ;;  %v5430_v18 = vpop.f32.mrb[2].mxu0 }
 0x16a   :  { %v6056_v19 = vadd.f32 %v5430_v18, %v5322_v23  ;;  %v1448_v20 = vpop.f32.mrb[3].mxu0  ;;  %v1528_v26 = vsel %vm1524_vm1, %v6052_v58, 0.0 }
 0x16b   :  { %v6058_v21 = vadd.f32 %v1448_v20, %v426_v33  ;;  %v1525_v22 = vsel %vm1524_vm1, %v6054_v62, 0.0 }
 0x16c   :  { %v1530_v31 = vsel %vm1524_vm1, %v6056_v19, 0.0 }
 0x16d   :  { %v1526_v24 = vsel %vm1524_vm1, %v6058_v21, 0.0 }
 0x16e   :  { %v1527_v25 = vadd.f32 %v1526_v24, %v1525_v22 }
 0x16f   :  { %v5433_v27 = vpop.f32.mrb[4].mxu0 }
 0x170   :  { %v1529_v28 = vadd.f32 %v1528_v26, %v1527_v25  ;;  %v5449_v29 = vadd.f32 %v5433_v27, %v5343_v34  ;;  %v1461_v30 = vpop.f32.mrb[5].mxu0 }
 0x171   :  { %v5450_v32 = vadd.f32 %v1461_v30, %v610_v35  ;;  %v5434_v36 = vpop.f32.mrb[6].mxu0 }
 0x172   :  { %v1531_v37 = vadd.f32 %v1530_v31, %v1529_v28  ;;  %v5451_v38 = vadd.f32 %v5434_v36, %v5344_v43  ;;  %v1464_v39 = vpop.f32.mrb[7].mxu0  ;;  %v1536_v54 = vsel %vm1524_vm1, %v5449_v29, 0.0 }
 0x173   :  { %v1532_v40 = vsel %vm1524_vm1, %v5450_v32, 0.0  ;;  %v5452_v41 = vadd.f32 %v1464_v39, %v613_v44 }
 0x174   :  { %v1533_v42 = vadd.f32 %v1532_v40, %v1531_v37  ;;  %v1538_v4 = vsel %vm1524_vm1, %v5451_v38, 0.0 }
 0x175   :  { %v1534_v45 = vsel %vm1524_vm1, %v5452_v41, 0.0 }
 0x176   :  { %v1535_v53 = vadd.f32 %v1534_v45, %v1533_v42 }
 0x177   :  { %v5437_v60 = vpop.f32.mrb[8].mxu0 }
 0x178   :  { %v1537_v61 = vadd.f32 %v1536_v54, %v1535_v53  ;;  %v5453_v63 = vadd.f32 %v5437_v60, %v5347_v46  ;;  %v1477_v3 = vpop.f32.mrb[9].mxu0 }
 0x179   :  { %v5454_v1 = vadd.f32 %v1477_v3, %v626_v47  ;;  %v5438_v7 = vpop.f32.mrb[10].mxu0 }
 0x17a   :  { %v1539_v56 = vadd.f32 %v1538_v4, %v1537_v61  ;;  %v5455_v8 = vadd.f32 %v5438_v7, %v5348_v48  ;;  %v1480_v9 = vpop.f32.mrb[11].mxu0  ;;  %v1544_v55 = vsel %vm1524_vm1, %v5453_v63, 0.0 }
 0x17b   :  { %v1540_v57 = vsel %vm1524_vm1, %v5454_v1, 0.0  ;;  %v5456_v6 = vadd.f32 %v1480_v9, %v629_v49 }
 0x17c   :  { %v1541_v11 = vadd.f32 %v1540_v57, %v1539_v56  ;;  %v1546_v10 = vsel %vm1524_vm1, %v5455_v8, 0.0 }
 0x17d   :  { %v1542_v12 = vsel %vm1524_vm1, %v5456_v6, 0.0 }
 0x17e   :  { %v1543_v13 = vadd.f32 %v1542_v12, %v1541_v11 }
 0x17f   :  { %v5441_v0 = vpop.f32.mrb[12].mxu0 }
 0x180   :  { %v1545_v2 = vadd.f32 %v1544_v55, %v1543_v13  ;;  %v5457_v5 = vadd.f32 %v5441_v0, %v5351_v50  ;;  %v1493_v14 = vpop.f32.mrb[13].mxu0 }
 0x181   :  { %v5458_v17 = vadd.f32 %v1493_v14, %v642_v51  ;;  %v5442_v23 = vpop.f32.mrb[14].mxu0 }
 0x182   :  { %v1547_v33 = vadd.f32 %v1546_v10, %v1545_v2  ;;  %v5459_v34 = vadd.f32 %v5442_v23, %v5352_v52  ;;  %v1496_v35 = vpop.f32.mrb[15].mxu0  ;;  %v1552_v49 = vsel %vm1524_vm1, %v5457_v5, 0.0 }
 0x183   :  { %v1548_v43 = vsel %vm1524_vm1, %v5458_v17, 0.0  ;;  %v5460_v44 = vadd.f32 %v1496_v35, %v645_v15 }
 0x184   :  { %v1549_v46 = vadd.f32 %v1548_v43, %v1547_v33  ;;  %v1554_v50 = vsel %vm1524_vm1, %v5459_v34, 0.0 }
 0x185   :  { %v1550_v47 = vsel %vm1524_vm1, %v5460_v44, 0.0 }
 0x186   :  { %v1551_v48 = vadd.f32 %v1550_v47, %v1549_v46 }
 0x188   :  { %v1553_v16 = vadd.f32 %v1552_v49, %v1551_v48 }
 0x18a   :  { %v1555_v59 = vadd.f32 %v1554_v50, %v1553_v16 }
 0x18c   :  { %v1556_v18 = vrot.slane %v1555_v59, 4 }
 0x18e   :  { %v1557_v20 = vadd.f32 %v1556_v18, %v1555_v59 }
 0x190   :  { %v1558_v51 = vrot.slane %v1557_v20, 2 }
 0x192   :  { %v1559_v22 = vadd.f32 %v1558_v51, %v1557_v20 }
 0x194   :  { %v1560_v24 = vrot.slane %v1559_v22, 1 }
 0x196   :  { %v1561_v52 = vadd.f32 %v1560_v24, %v1559_v22 }
 0x198   :  { %v1562_v25 = vmul.f32 0.0078125, %v1561_v52 }
 0x19a   :  { %v6081_v26 = vsub.f32 %v6054_v62, %v1562_v25  ;;  %v6084_v15 = vsub.f32 %v6058_v21, %v1562_v25  ;;  %v6087_v27 = vsub.f32 %v6052_v58, %v1562_v25  ;;  %v6090_v28 = vsub.f32 %v6056_v19, %v1562_v25 }
 0x19b   :  { %v6092_v30 = vsub.f32 %v5450_v32, %v1562_v25  ;;  %v6094_v31 = vsub.f32 %v5452_v41, %v1562_v25  ;;  %v6096_v36 = vsub.f32 %v5449_v29, %v1562_v25  ;;  %v6098_v37 = vsub.f32 %v5451_v38, %v1562_v25 }
 0x19c   :  { %v6100_v39 = vsub.f32 %v5454_v1, %v1562_v25  ;;  %v6102_v62 = vsub.f32 %v5456_v6, %v1562_v25  ;;  %v6104_v21 = vsub.f32 %v5453_v63, %v1562_v25  ;;  %v6106_v40 = vsub.f32 %v5455_v8, %v1562_v25 }
 0x19d   :  { %v6108_v58 = vsub.f32 %v5458_v17, %v1562_v25  ;;  %v6110_v19 = vsub.f32 %v5460_v44, %v1562_v25  ;;  %v6112_v32 = vsub.f32 %v5457_v5, %v1562_v25  ;;  %v6114_v41 = vsub.f32 %v5459_v34, %v1562_v25 }
 0x19e   :  { %v1579_v29 = vmul.f32 %v6081_v26, %v6081_v26  ;;  %v1580_v38 = vmul.f32 %v6084_v15, %v6084_v15  ;;  %v1581_v42 = vmul.f32 %v6087_v27, %v6087_v27  ;;  %v1582_v45 = vmul.f32 %v6090_v28, %v6090_v28 }
 0x19f   :  { %v1583_v61 = vmul.f32 %v6092_v30, %v6092_v30  ;;  %v1584_v4 = vmul.f32 %v6094_v31, %v6094_v31  ;;  %v1585_v56 = vmul.f32 %v6096_v36, %v6096_v36  ;;  %v1586_v57 = vmul.f32 %v6098_v37, %v6098_v37 }
 0x1a0   :  { %v1595_v53 = vsel %vm1524_vm1, %v1579_v29, 0.0  ;;  %v1596_v54 = vsel %vm1524_vm1, %v1580_v38, 0.0  ;;  %v1598_v63 = vsel %vm1524_vm1, %v1581_v42, 0.0  ;;  %v1600_v1 = vsel %vm1524_vm1, %v1582_v45, 0.0 }
 0x1a1   :  { %v1597_v60 = vadd.f32 %v1596_v54, %v1595_v53  ;;  %v1602_v8 = vsel %vm1524_vm1, %v1583_v61, 0.0  ;;  %v1604_v6 = vsel %vm1524_vm1, %v1584_v4, 0.0  ;;  %v1587_v12 = vmul.f32 %v6100_v39, %v6100_v39 }
 0x1a2   :  { %v1606_v13 = vsel %vm1524_vm1, %v1585_v56, 0.0  ;;  %v1588_v0 = vmul.f32 %v6102_v62, %v6102_v62  ;;  %v1608_v2 = vsel %vm1524_vm1, %v1586_v57, 0.0  ;;  %v1589_v14 = vmul.f32 %v6104_v21, %v6104_v21 }
 0x1a3   :  { %v1599_v3 = vadd.f32 %v1598_v63, %v1597_v60  ;;  %v1610_v10 = vsel %vm1524_vm1, %v1587_v12, 0.0  ;;  %v1590_v23 = vmul.f32 %v6106_v40, %v6106_v40  ;;  %v1591_v35 = vmul.f32 %v6108_v58, %v6108_v58  ;;  %v6172_v12 = vld [vmem:[%s7383_s3] ss:$0 sm:$0xff]  ;;  %s5593_s3 = smov 32  }
 0x1a4   :  { %v1612_v33 = vsel %vm1524_vm1, %v1588_v0, 0.0  ;;  %v1614_v43 = vsel %vm1524_vm1, %v1589_v14, 0.0  ;;  %v1592_v46 = vmul.f32 %v6110_v19, %v6110_v19  ;;  %v1593_v49 = vmul.f32 %v6112_v32, %v6112_v32 }
 0x1a5   :  { %v1601_v7 = vadd.f32 %v1600_v1, %v1599_v3  ;;  %v1616_v47 = vsel %vm1524_vm1, %v1590_v23, 0.0  ;;  %v1618_v16 = vsel %vm1524_vm1, %v1591_v35, 0.0  ;;  %v1594_v59 = vmul.f32 %v6114_v41, %v6114_v41  ;;  %v1633_v1 = vld [vmem:[%s7382_s2] sm:$0x1]  ;;  %s5592_s2 = smov 64  }
 0x1a6   :  { %v1620_v18 = vsel %vm1524_vm1, %v1592_v46, 0.0  ;;  %v1622_v51 = vsel %vm1524_vm1, %v1593_v49, 0.0  ;;  %v1638_v61 = vlaneseq  ;;  %v5590_v3 = vmov 1983009808  }
 0x1a7   :  { %v1603_v9 = vadd.f32 %v1602_v8, %v1601_v7  ;;  %v1624_v24 = vsel %vm1524_vm1, %v1594_v59, 0.0  ;;  %v1703_v4 = vunpack.c.l.s4 %v5590_v3 }
 0x1a8   :  { %v1639_v63 = vshrl.u32 %v1638_v61, 7 }
 0x1a9   :  { %v1605_v11 = vadd.f32 %v1604_v6, %v1603_v9  ;;  %v1704_v8 = vunpack.c.0.s8 %v1703_v4  ;;  %v5591_v9 = vmov 1934713408  }
 0x1aa   :  { %v1640_v7 = vsub.s32 0, %v1639_v63  ;;  %v1767_v57 = vunpack.c.l.s4 %v5591_v9 }
 0x1ab   :  { %v1607_v55 = vadd.f32 %v1606_v13, %v1605_v11  ;;  %v6174_v13 = vsub.s32 %v1704_v8, %v1639_v63 }
 0x1ad   :  { %v1609_v5 = vadd.f32 %v1608_v2, %v1607_v55  ;;  %v1768_v55 = vunpack.c.0.s8 %v1767_v57 }
 0x1af   :  { %v1611_v17 = vadd.f32 %v1610_v10, %v1609_v5  ;;  %v6209_v35 = vsub.s32 %v1768_v55, %v1639_v63 }
 0x1b1   :  { %v1613_v34 = vadd.f32 %v1612_v33, %v1611_v17 }
 0x1b3   :  { %v1615_v44 = vadd.f32 %v1614_v43, %v1613_v34 }
 0x1b5   :  { %v1617_v48 = vadd.f32 %v1616_v47, %v1615_v44 }
 0x1b7   :  { %v1619_v50 = vadd.f32 %v1618_v16, %v1617_v48 }
 0x1b9   :  { %v1621_v20 = vadd.f32 %v1620_v18, %v1619_v50 }
 0x1bb   :  { %v1623_v22 = vadd.f32 %v1622_v51, %v1621_v20 }
 0x1bd   :  { %v1625_v52 = vadd.f32 %v1624_v24, %v1623_v22 }
 0x1bf   :  { %v1626_v25 = vrot.slane %v1625_v52, 4 }
 0x1c1   :  { %v1627_v29 = vadd.f32 %v1626_v25, %v1625_v52 }
 0x1c3   :  { %v1628_v38 = vrot.slane %v1627_v29, 2 }
 0x1c5   :  { %v1629_v42 = vadd.f32 %v1628_v38, %v1627_v29 }
 0x1c7   :  { %v1630_v45 = vrot.slane %v1629_v42, 1 }
 0x1c9   :  { %v1631_v53 = vadd.f32 %v1630_v45, %v1629_v42 }
 0x1cb   :  { %v1632_v54 = vmul.f32 0.0078125, %v1631_v53 }
 0x1cd   :  { %v1634_v60 = vadd.f32 1e-05, %v1632_v54 }
 0x1cf   :  { %5588 = vrsqrt.f32 %v1634_v60 }
 0x1d9   :  { %v5589_v56 = vpop.eup %5588 }
 0x1da   :  { %v1636_v6 = vmul.f32 %v5589_v56, %v1633_v1 }
 0x1dc   :  { %v6167_v11 = vrot.slane %v1636_v6, %v1640_v7 }
 0x1de   :  { %v6178_v0 = vmul.f32 %v6167_v11, %v6102_v62  ;;  %v6182_v2 = vmul.f32 %v6167_v11, %v6104_v21  ;;  %v1654_v5 = vmul.f32 %v6167_v11, %v6106_v40  ;;  %v1655_v14 = vmul.f32 %v6167_v11, %v6108_v58 }
 0x1df   :  { %v1656_v10 = vmul.f32 %v6167_v11, %v6110_v19  ;;  %v1657_v17 = vmul.f32 %v6167_v11, %v6112_v32  ;;  %v1658_v62 = vmul.f32 %v6167_v11, %v6114_v41  ;;  %v1647_v23 = vmul.f32 %v6167_v11, %v6092_v30 }
 0x1e0   :  { %v6197_v21 = vadd.f32 %v6172_v12, %v1654_v5  ;;  %v1678_v40 = vadd.f32 %v6172_v12, %v1655_v14  ;;  %v1648_v58 = vmul.f32 %v6167_v11, %v6094_v31  ;;  %v1649_v19 = vmul.f32 %v6167_v11, %v6096_v36 }
 0x1e1   :  { %v1679_v33 = vadd.f32 %v6172_v12, %v1656_v10  ;;  %v1680_v32 = vadd.f32 %v6172_v12, %v1657_v17  ;;  %v1681_v41 = vadd.f32 %v6172_v12, %v1658_v62  ;;  %v1650_v30 = vmul.f32 %v6167_v11, %v6098_v37 }
 0x1e2   :  { %v1694_v34 = vmax.f32 %v1678_v40, 0.0  ;;  %v1670_v43 = vadd.f32 %v6172_v12, %v1647_v23  ;;  %v1671_v44 = vadd.f32 %v6172_v12, %v1648_v58  ;;  %v1672_v36 = vadd.f32 %v6172_v12, %v1649_v19 }
 0x1e3   :  { %v1695_v31 = vmax.f32 %v1679_v33, 0.0  ;;  %v1696_v46 = vmax.f32 %v1680_v32, 0.0  ;;  %v1697_v47 = vmax.f32 %v1681_v41, 0.0  ;;  %v1673_v48 = vadd.f32 %v6172_v12, %v1650_v30 }
 0x1e4   :  { %v1686_v49 = vmax.f32 %v1670_v43, 0.0  ;;  %v1687_v16 = vmax.f32 %v1671_v44, 0.0  ;;  %v1643_v50 = vmul.f32 %v6167_v11, %v6081_v26  ;;  %v1688_v51 = vmax.f32 %v1672_v36, 0.0 }
 0x1e5   :  { %v3398_v37 = vcombine.low %v1694_v34, %v1696_v46  ;;  %v3399_v59 = vcombine.high %v1694_v34, %v1696_v46  ;;  %v3414_v18 = vcombine.low %v1695_v31, %v1697_v47  ;;  %v3415_v20 = vcombine.high %v1695_v31, %v1697_v47 }
 0x1e6   :  { %v1689_v22 = vmax.f32 %v1673_v48, 0.0  ;;  %v1644_v24 = vmul.f32 %v6167_v11, %v6084_v15  ;;  %v1645_v52 = vmul.f32 %v6167_v11, %v6087_v27  ;;  %v1732_v42 = vcombine.low %v1686_v49, %v1688_v51 }
 0x1e7   :  { %v6222_v25 = vrot.slane %v3398_v37, %v6174_v13  ;;  %v6225_v29 = vrot.slane %v3399_v59, %v6174_v13  ;;  %v6228_v26 = vrot.slane %v3414_v18, %v6174_v13  ;;  %v6231_v38 = vrot.slane %v3415_v20, %v6174_v13 }
 0x1e8   :  { %v1733_v45 = vcombine.high %v1686_v49, %v1688_v51  ;;  %v1748_v53 = vcombine.low %v1687_v16, %v1689_v22  ;;  %v1749_v54 = vcombine.high %v1687_v16, %v1689_v22  ;;  %v1740_v63 = vrot.slane %v1732_v42, %v6174_v13 }
 0x1e9   :  { %v3462_v15 = vcombine.low %v6222_v25, %v6228_v26  ;;  %v3463_v27 = vcombine.high %v6222_v25, %v6228_v26  ;;  %v3478_v60 = vcombine.low %v6225_v29, %v6231_v38  ;;  %v3479_v61 = vcombine.high %v6225_v29, %v6231_v38 }
 0x1ea   :  { %v1747_v3 = vrot.slane %v1733_v45, %v6174_v13  ;;  %v1756_v4 = vrot.slane %v1748_v53, %v6174_v13  ;;  %v1763_v1 = vrot.slane %v1749_v54, %v6174_v13  ;;  %v1646_v7 = vmul.f32 %v6167_v11, %v6090_v28 }
 0x1eb   :  { %v1666_v56 = vadd.f32 %v6172_v12, %v1643_v50  ;;  %v1667_v8 = vadd.f32 %v6172_v12, %v1644_v24  ;;  %v1668_v9 = vadd.f32 %v6172_v12, %v1645_v52  ;;  %v1651_v41 = vmul.f32 %v6167_v11, %v6100_v39 }
 0x1ec   :  { %v1796_v57 = vcombine.low %v1740_v63, %v1756_v4  ;;  %v1797_v6 = vcombine.high %v1740_v63, %v1756_v4  ;;  %v1812_v55 = vcombine.low %v1747_v3, %v1763_v1  ;;  %v1813_v5 = vcombine.high %v1747_v3, %v1763_v1 }
 0x1ed   :  { %v1669_v14 = vadd.f32 %v6172_v12, %v1646_v7  ;;  %v1682_v10 = vmax.f32 %v1666_v56, 0.0  ;;  %v1683_v17 = vmax.f32 %v1667_v8, 0.0  ;;  %v1684_v62 = vmax.f32 %v1668_v9, 0.0 }
 0x1ee   :  { %v1804_v23 = vrot.slane %v1796_v57, %v6209_v35  ;;  %v1811_v40 = vrot.slane %v1797_v6, %v6209_v35  ;;  %v1820_v28 = vrot.slane %v1812_v55, %v6209_v35  ;;  %v1827_v58 = vrot.slane %v1813_v5, %v6209_v35 }
 0x1ef   :  { %v1685_v19 = vmax.f32 %v1669_v14, 0.0  ;;  %v1700_v33 = vcombine.low %v1682_v10, %v1684_v62  ;;  %v1701_v32 = vcombine.high %v1682_v10, %v1684_v62  ;;  %v1674_v37 = vadd.f32 %v6172_v12, %v1651_v41 }
 0x1f0   :  { %v5141_v30 = vcombine.low %v1804_v23, %v1811_v40  ;;  %v5143_v34 = vcombine.high %v1804_v23, %v1811_v40  ;;  %v5145_v43 = vcombine.low %v1820_v28, %v1827_v58  ;;  %v5147_v44 = vcombine.high %v1820_v28, %v1827_v58 }
 0x1f1   :  { %v1708_v31 = vrot.slane %v1700_v33, %v6174_v13  ;;  %v1715_v46 = vrot.slane %v1701_v32, %v6174_v13  ;;  %v1716_v47 = vcombine.low %v1683_v17, %v1685_v19  ;;  %v1717_v36 = vcombine.high %v1683_v17, %v1685_v19 }
 0x1f2   :  { %v1851_v48 = vrot.slane %v5141_v30, %v6174_v13  ;;  %v1867_v49 = vrot.slane %v5143_v34, %v6174_v13  ;;  %v1883_v16 = vrot.slane %v5145_v43, %v6174_v13  ;;  %v1899_v50 = vrot.slane %v5147_v44, %v6174_v13 }
 0x1f3   :  { %v1724_v39 = vrot.slane %v1716_v47, %v6174_v13  ;;  %v1731_v11 = vrot.slane %v1717_v36, %v6174_v13  ;;  %v1675_v59 = vadd.f32 %v6172_v12, %v6178_v0  ;;  %v1693_v10 = vmax.f32 %v6197_v21, 0.0 }
 0x1f4   :  { %v1917_v18 = vcombine.high %v1851_v48, %v1867_v49  ;;  %v1949_v20 = vcombine.high %v1883_v16, %v1899_v50  ;;  %v1916_v51 = vcombine.low %v1851_v48, %v1867_v49  ;;  %v1948_v22 = vcombine.low %v1883_v16, %v1899_v50 }
 0x1f5   :  { %v1764_v24 = vcombine.low %v1708_v31, %v1724_v39  ;;  %v1765_v52 = vcombine.high %v1708_v31, %v1724_v39  ;;  %v1780_v42 = vcombine.low %v1715_v46, %v1731_v11  ;;  %v1781_v45 = vcombine.high %v1715_v46, %v1731_v11 }
 0x1f6   :  { %v6269_v53 = vrot.slane %v1917_v18, %v6209_v35  ;;  %v6272_v54 = vrot.slane %v1949_v20, %v6209_v35  ;;  %v6275_v63 = vrot.slane %v1916_v51, %v6209_v35  ;;  %v6278_v3 = vrot.slane %v1948_v22, %v6209_v35 }
 0x1f7   :  { %v1772_v0 = vrot.slane %v1764_v24, %v6209_v35  ;;  %v1779_v4 = vrot.slane %v1765_v52, %v6209_v35  ;;  %v1788_v1 = vrot.slane %v1780_v42, %v6209_v35  ;;  %v1795_v7 = vrot.slane %v1781_v45, %v6209_v35 }
 0x1f8   :  { %v1970_v56 = vcombine.low %v6269_v53, %v6272_v54  ;;  %v1969_v8 = vcombine.high %v6275_v63, %v6278_v3  ;;  %v1968_v9 = vcombine.low %v6275_v63, %v6278_v3  ;;  %v1971_v57 = vcombine.high %v6269_v53, %v6272_v54  ;;  %v6429_v63 = vld [vmem:[%s7384_s5] sm:$0xff]  ;;  %v6437_v3 = vld [vmem:[%s7384_s5 + $0x8] sm:$0xff] }
 0x1f9   :  { %v5140_v6 = vcombine.low %v1772_v0, %v1779_v4  ;;  %v5142_v55 = vcombine.high %v1772_v0, %v1779_v4  ;;  %v5144_v5 = vcombine.low %v1788_v1, %v1795_v7  ;;  %v5146_v14 = vcombine.high %v1788_v1, %v1795_v7 }
 0x1fa   :  { %1989 = vrot.lane.b32.xlu1 %v1970_v56, %s5592_s2  ;;  %1985 = vrot.lane.b32.xlu0 %v1969_v8, %s5593_s3  ;;  %v1676_v17 = vadd.f32 %v6172_v12, %v6182_v2  ;;  %v1690_v62 = vmax.f32 %v1674_v37, 0.0  ;;  %v1691_v19 = vmax.f32 %v1675_v59, 0.0  ;;  %v5594_v34 = vmov 0.0  }
 0x1fb   :  { %v1844_v23 = vrot.slane %v5140_v6, %v6174_v13  ;;  %v1860_v40 = vrot.slane %v5142_v55, %v6174_v13  ;;  %v1876_v28 = vrot.slane %v5144_v5, %v6174_v13  ;;  %v1892_v58 = vrot.slane %v5146_v14, %v6174_v13  ;;  %2161 = vmatprep.mubr.f32.mxu1 %v5594_v34 }
 0x1fc   :  { %v1692_v21 = vmax.f32 %v1676_v17, 0.0  ;;  %v3382_v2 = vcombine.low %v1691_v19, %v1693_v10  ;;  %v3383_v44 = vcombine.high %v1691_v19, %v1693_v10  ;;  %v2004_v59 = vcombine.low %v5594_v34, %v5594_v34 }
 0x1fd   :  { %v1901_v33 = vcombine.high %v1844_v23, %v1860_v40  ;;  %v1933_v32 = vcombine.high %v1876_v28, %v1892_v58  ;;  %v1900_v41 = vcombine.low %v1844_v23, %v1860_v40  ;;  %v1932_v30 = vcombine.low %v1876_v28, %v1892_v58 }
 0x1fe   :  { %v3366_v43 = vcombine.low %v1690_v62, %v1692_v21  ;;  %v3367_v12 = vcombine.high %v1690_v62, %v1692_v21  ;;  %v3390_v16 = vrot.slane %v3382_v2, %v6174_v13  ;;  %v3397_v50 = vrot.slane %v3383_v44, %v6174_v13 }
 0x1ff   :  { %v1915_v31 = vrot.slane %v1901_v33, %v6209_v35  ;;  %v1947_v46 = vrot.slane %v1933_v32, %v6209_v35  ;;  %v6305_v47 = vrot.slane %v1900_v41, %v6209_v35  ;;  %v6308_v36 = vrot.slane %v1932_v30, %v6209_v35 }
 0x200   :  { %v3374_v48 = vrot.slane %v3366_v43, %v6174_v13  ;;  %v3381_v49 = vrot.slane %v3367_v12, %v6174_v13  ;;  %v2005_v18 = vcombine.high %v5594_v34, %v5594_v34  ;;  %v2012_v52 = vrot.slane %v2004_v59, %v6174_v13 }
 0x201   :  { %v1966_v39 = vcombine.low %v1915_v31, %v1947_v46  ;;  %v1965_v11 = vcombine.high %v6305_v47, %v6308_v36  ;;  %v1964_v37 = vcombine.low %v6305_v47, %v6308_v36  ;;  %v1967_v54 = vcombine.high %v1915_v31, %v1947_v46 }
 0x202   :  { %v3430_v20 = vcombine.low %v3374_v48, %v3390_v16  ;;  %v3431_v51 = vcombine.high %v3374_v48, %v3390_v16  ;;  %v3446_v22 = vcombine.low %v3381_v49, %v3397_v50  ;;  %v3447_v24 = vcombine.high %v3381_v49, %v3397_v50 }
 0x203   :  { %1977 = vrot.lane.b32.xlu1 %v1966_v39, %s5592_s2  ;;  %1973 = vrot.lane.b32.xlu0 %v1965_v11, %s5593_s3  ;;  %v2019_v42 = vrot.slane %v2005_v18, %v6174_v13  ;;  %v3470_v1 = vrot.slane %v3462_v15, %v6209_v35  ;;  %v2020_v7 = vcombine.low %v2012_v52, %v2012_v52 }
 0x204   :  { %v3438_v45 = vrot.slane %v3430_v20, %v6209_v35  ;;  %v3445_v53 = vrot.slane %v3431_v51, %v6209_v35  ;;  %v3454_v0 = vrot.slane %v3446_v22, %v6209_v35  ;;  %v3461_v4 = vrot.slane %v3447_v24, %v6209_v35 }
 0x205   :  { %v2036_v56 = vcombine.low %v2019_v42, %v2019_v42  ;;  %v2021_v8 = vcombine.high %v2012_v52, %v2012_v52  ;;  %v2037_v6 = vcombine.high %v2019_v42, %v2019_v42  ;;  %v6337_v10 = vrot.slane %v2020_v7, %v6209_v35 }
 0x206   :  { %v5154_v55 = vcombine.low %v3438_v45, %v3445_v53  ;;  %v5156_v5 = vcombine.high %v3438_v45, %v3445_v53  ;;  %v5158_v14 = vcombine.low %v3454_v0, %v3461_v4  ;;  %v5160_v28 = vcombine.high %v3454_v0, %v3461_v4 }
 0x207   :  { %1981 = vrot.lane.b32.xlu1 %v1967_v54, %s5595_s17  ;;  %1993 = vrot.lane.b32.xlu0 %v1971_v57, %s5595_s17  ;;  %v6340_v17 = vrot.slane %v2036_v56, %v6209_v35  ;;  %v2035_v15 = vrot.slane %v2021_v8, %v6209_v35  ;;  %v2051_v62 = vrot.slane %v2037_v6, %v6209_v35 }
 0x208   :  { %v3510_v23 = vrot.slane %v5154_v55, %v6174_v13  ;;  %v3526_v40 = vrot.slane %v5156_v5, %v6174_v13  ;;  %v3477_v57 = vrot.slane %v3463_v27, %v6209_v35  ;;  %v2053_v58 = vcombine.high %v6337_v10, %v6337_v10 }
 0x209   :  { %v2057_v19 = vcombine.high %v6340_v17, %v6340_v17  ;;  %v3542_v21 = vrot.slane %v5158_v14, %v6174_v13  ;;  %v3486_v33 = vrot.slane %v3478_v60, %v6209_v35  ;;  %v2054_v32 = vcombine.low %v2035_v15, %v2035_v15 }
 0x20a   :  { %v2058_v41 = vcombine.low %v2051_v62, %v2051_v62  ;;  %v2055_v30 = vcombine.high %v2035_v15, %v2035_v15  ;;  %v3558_v25 = vrot.slane %v5160_v28, %v6174_v13  ;;  %v3566_v26 = vcombine.low %v3510_v23, %v3526_v40 }
 0x20b   :  { %2061 = vrot.lane.b32.xlu0 %v2053_v58, %s5593_s3  ;;  %2073 = vrot.lane.b32.xlu1 %v2057_v19, %s5593_s3  ;;  %v3493_v27 = vrot.slane %v3479_v61, %v6209_v35  ;;  %v2059_v43 = vcombine.high %v2051_v62, %v2051_v62  ;;  %v5155_v12 = vcombine.low %v3470_v1, %v3477_v57 }
 0x20c   :  { %v5157_v2 = vcombine.high %v3470_v1, %v3477_v57  ;;  %v3567_v44 = vcombine.high %v3510_v23, %v3526_v40  ;;  %v6367_v60 = vrot.slane %v3566_v26, %v6209_v35  ;;  %v3598_v31 = vcombine.low %v3542_v21, %v3558_v25 }
 0x20d   :  { %v5159_v46 = vcombine.low %v3486_v33, %v3493_v27  ;;  %v5161_v48 = vcombine.high %v3486_v33, %v3493_v27  ;;  %v3517_v49 = vrot.slane %v5155_v12, %v6174_v13  ;;  %v3599_v39 = vcombine.high %v3542_v21, %v3558_v25 }
 0x20e   :  { %v3533_v16 = vrot.slane %v5157_v2, %v6174_v13  ;;  %v6372_v50 = vrot.slane %v3567_v44, %v6209_v35  ;;  %v6377_v29 = vrot.slane %v3598_v31, %v6209_v35  ;;  %v2052_v36 = vcombine.low %v6337_v10, %v6337_v10 }
 0x20f   :  { %2065 = vrot.lane.b32.xlu0 %v2054_v32, %s5592_s2  ;;  %2077 = vrot.lane.b32.xlu1 %v2058_v41, %s5592_s2  ;;  %v3549_v38 = vrot.slane %v5159_v46, %v6174_v13  ;;  %v3565_v61 = vrot.slane %v5161_v48, %v6174_v13  ;;  %v6382_v18 = vrot.slane %v3599_v39, %v6209_v35 }
 0x210   :  { %v3582_v11 = vcombine.low %v3517_v49, %v3533_v16  ;;  %v3583_v59 = vcombine.high %v3517_v49, %v3533_v16  ;;  %v3631_v20 = vcombine.high %v6367_v60, %v6377_v29  ;;  %v3630_v22 = vcombine.low %v6367_v60, %v6377_v29 }
 0x211   :  { %v3614_v51 = vcombine.low %v3549_v38, %v3565_v61  ;;  %v3615_v24 = vcombine.high %v3549_v38, %v3565_v61  ;;  %v3632_v45 = vcombine.low %v6372_v50, %v6382_v18  ;;  %v3633_v53 = vcombine.high %v6372_v50, %v6382_v18 }
 0x212   :  { %v6389_v52 = vrot.slane %v3582_v11, %v6209_v35  ;;  %v6392_v42 = vrot.slane %v3583_v59, %v6209_v35  ;;  %v2056_v21 = vcombine.low %v6340_v17, %v6340_v17 }
 0x213   :  { %2069 = vrot.lane.b32.xlu0 %v2055_v30, %s5595_s17  ;;  %2081 = vrot.lane.b32.xlu1 %v2059_v43, %s5595_s17  ;;  %v6401_v54 = vrot.slane %v3614_v51, %v6209_v35  ;;  %v6404_v0 = vrot.slane %v3615_v24, %v6209_v35 }
 0x215   :  { %v3635_v4 = vcombine.high %v6389_v52, %v6401_v54  ;;  %v3634_v1 = vcombine.low %v6389_v52, %v6401_v54  ;;  %v3636_v7 = vcombine.low %v6392_v42, %v6404_v0  ;;  %v3637_v56 = vcombine.high %v6392_v42, %v6404_v0 }
 0x26c   :  { %v1990_v8 = vpop.permute.xlu1 %1989  ;;  %v1986_v6 = vpop.permute.xlu0 %1985 }
 0x26d   :  { %v2001_v14 = vsel %vm1524_vm1, %v1968_v9, %v1986_v6 }
 0x26e   :  { %v2002_v28 = vsel %vm1997_vm2, %v2001_v14, %v1990_v8 }
 0x275   :  { %v1978_v55 = vpop.permute.xlu1 %1977  ;;  %v1974_v5 = vpop.permute.xlu0 %1973 }
 0x276   :  { %v1996_v15 = vsel %vm1524_vm1, %v1964_v37, %v1974_v5 }
 0x277   :  { %v1998_v23 = vsel %vm1997_vm2, %v1996_v15, %v1978_v55 }
 0x279   :  { %v1982_v62 = vpop.permute.xlu1 %1981  ;;  %v1994_v40 = vpop.permute.xlu0 %1993 }
 0x27a   :  { %v2000_v57 = vsel %vm1999_vm3, %v1998_v23, %v1982_v62  ;;  %v2003_v58 = vsel %vm1999_vm3, %v2002_v28, %v1994_v40 }
 0x27b   :  { %2097 = vmatprep.subr.mxu1 %v2003_v58 }
 0x27c   :  { %2098 = vmatpush1.msra.mxu1 %v2000_v57 }
 0x27d   :  { %5148 = vmatmul.mubr.msk.f32.vlgmr.msra.gmra.mrb[16].mxu1 %vm2090_vm4, %v6429_v63  ;;  %v2062_v9 = vpop.permute.xlu0 %2061  ;;  %v2074_v47 = vpop.permute.xlu1 %2073 }
 0x27e   :  { %2167 = vmatprep.mubr.f32.mxu1 %v5594_v34  ;;  %v2084_v19 = vsel %vm1524_vm1, %v2052_v36, %v2062_v9  ;;  %v2087_v30 = vsel %vm1524_vm1, %v2056_v21, %v2074_v47 }
 0x281   :  { %5149 = vmatmul.mubr.msk.f32.gmra.mrb[18].mxu1 %vm2090_vm4, %v6437_v3  ;;  %v2066_v37 = vpop.permute.xlu0 %2065  ;;  %v2078_v33 = vpop.permute.xlu1 %2077 }
 0x282   :  { %2618 = vmatprep.mubr.f32.mxu1 %v5594_v34  ;;  %v2085_v32 = vsel %vm1997_vm2, %v2084_v19, %v2066_v37  ;;  %v2088_v27 = vsel %vm1997_vm2, %v2087_v30, %v2078_v33 }
 0x285   :  { %v2070_v41 = vpop.permute.xlu0 %2069  ;;  %v2082_v43 = vpop.permute.xlu1 %2081 }
 0x286   :  { %v6450_v25 = vsel %vm1999_vm3, %v2085_v32, %v2070_v41  ;;  %v6457_v17 = vsel %vm1999_vm3, %v2088_v27, %v2082_v43 }
 0x350   :  { %v2163_v26 = vpop.f32.mrb[16].mxu1 }
 0x351   :  { %v2164_v10 = vadd.f32 %v2163_v26, %v6450_v25  ;;  %v2165_v12 = vpop.f32.mrb[17].mxu1 }
 0x352   :  { %v2166_v44 = vadd.f32 %v2165_v12, %v6457_v17 }
 0x353   :  { %2182 = vrot.lane.b32.xlu1 %v2164_v10, %s5592_s2  ;;  %2176 = vrot.lane.b32.xlu0 %v2164_v10, %s5595_s17 }
 0x354   :  { %v2169_v2 = vpop.f32.mrb[18].mxu1 }
 0x355   :  { %v2171_v31 = vpop.f32.mrb[19].mxu1  ;;  %v6465_v46 = vadd.f32 %v2169_v2, %v6450_v25 }
 0x356   :  { %v6472_v48 = vadd.f32 %v2171_v31, %v6457_v17 }
 0x357   :  { %2196 = vrot.lane.b32.xlu1 %v2166_v44, %s5595_s17  ;;  %2188 = vrot.lane.b32.xlu0 %v2164_v10, %s5593_s3 }
 0x35b   :  { %2208 = vrot.lane.b32.xlu1 %v2166_v44, %s5593_s3  ;;  %2202 = vrot.lane.b32.xlu0 %v2166_v44, %s5592_s2 }
 0x35f   :  { %2184 = vrot.lane.b32.xlu1 %v6465_v46, %s5592_s2  ;;  %2178 = vrot.lane.b32.xlu0 %v6465_v46, %s5595_s17 }
 0x363   :  { %2198 = vrot.lane.b32.xlu1 %v6472_v48, %s5595_s17  ;;  %2190 = vrot.lane.b32.xlu0 %v6465_v46, %s5593_s3 }
 0x367   :  { %2210 = vrot.lane.b32.xlu1 %v6472_v48, %s5593_s3  ;;  %2204 = vrot.lane.b32.xlu0 %v6472_v48, %s5592_s2 }
 0x36b   :  { %3639 = vrot.lane.b32.xlu1 %v3631_v20, %s5593_s3  ;;  %3651 = vrot.lane.b32.xlu0 %v3635_v4, %s5593_s3 }
 0x3c5   :  { %v2183_v49 = vpop.permute.xlu1 %2182  ;;  %v2177_v16 = vpop.permute.xlu0 %2176 }
 0x3c6   :  { %v2216_v61 = vcombine.low %v2164_v10, %v2183_v49  ;;  %v2217_v11 = vcombine.high %v2164_v10, %v2183_v49 }
 0x3c8   :  { %v2224_v5 = vrot.slane %v2216_v61, %v6174_v13  ;;  %v2231_v20 = vrot.slane %v2217_v11, %v6174_v13 }
 0x3c9   :  { %v2197_v39 = vpop.permute.xlu1 %2196  ;;  %v2189_v38 = vpop.permute.xlu0 %2188 }
 0x3ca   :  { %v2232_v59 = vcombine.low %v2177_v16, %v2189_v38  ;;  %v2233_v51 = vcombine.high %v2177_v16, %v2189_v38 }
 0x3cc   :  { %v2240_v24 = vrot.slane %v2232_v59, %v6174_v13  ;;  %v2247_v8 = vrot.slane %v2233_v51, %v6174_v13 }
 0x3cd   :  { %v2209_v6 = vpop.permute.xlu1 %2208  ;;  %v2203_v55 = vpop.permute.xlu0 %2202 }
 0x3ce   :  { %v2264_v14 = vcombine.low %v2197_v39, %v2209_v6  ;;  %v2265_v4 = vcombine.high %v2197_v39, %v2209_v6  ;;  %v2248_v15 = vcombine.low %v2166_v44, %v2203_v55  ;;  %v2249_v62 = vcombine.high %v2166_v44, %v2203_v55 }
 0x3cf   :  { %v2280_v23 = vcombine.low %v2224_v5, %v2240_v24  ;;  %v2296_v40 = vcombine.low %v2231_v20, %v2247_v8  ;;  %v2281_v33 = vcombine.high %v2224_v5, %v2240_v24  ;;  %v2297_v32 = vcombine.high %v2231_v20, %v2247_v8 }
 0x3d0   :  { %v2272_v28 = vrot.slane %v2264_v14, %v6174_v13  ;;  %v2279_v57 = vrot.slane %v2265_v4, %v6174_v13  ;;  %v2256_v58 = vrot.slane %v2248_v15, %v6174_v13  ;;  %v2263_v9 = vrot.slane %v2249_v62, %v6174_v13 }
 0x3d1   :  { %v2185_v47 = vpop.permute.xlu1 %2184  ;;  %v2179_v36 = vpop.permute.xlu0 %2178  ;;  %v6496_v30 = vrot.slane %v2296_v40, %v6209_v35  ;;  %v6503_v12 = vrot.slane %v2280_v23, %v6209_v35  ;;  %v2311_v59 = vrot.slane %v2297_v32, %v6209_v35  ;;  %v2295_v14 = vrot.slane %v2281_v33, %v6209_v35 }
 0x3d2   :  { %v2312_v37 = vcombine.low %v2256_v58, %v2272_v28  ;;  %v2328_v19 = vcombine.low %v2263_v9, %v2279_v57  ;;  %v2329_v21 = vcombine.high %v2263_v9, %v2279_v57  ;;  %v2313_v41 = vcombine.high %v2256_v58, %v2272_v28 }
 0x3d3   :  { %v2352_v26 = vcombine.low %v6465_v46, %v2185_v47  ;;  %v2353_v44 = vcombine.high %v6465_v46, %v2185_v47 }
 0x3d4   :  { %v6500_v43 = vrot.slane %v2328_v19, %v6209_v35  ;;  %v6506_v2 = vrot.slane %v2312_v37, %v6209_v35  ;;  %v2343_v16 = vrot.slane %v2329_v21, %v6209_v35  ;;  %v2327_v51 = vrot.slane %v2313_v41, %v6209_v35 }
 0x3d5   :  { %v2199_v27 = vpop.permute.xlu1 %2198  ;;  %v2191_v10 = vpop.permute.xlu0 %2190  ;;  %v2360_v55 = vrot.slane %v2352_v26, %v6174_v13  ;;  %v2367_v5 = vrot.slane %v2353_v44, %v6174_v13 }
 0x3d6   :  { %v2368_v31 = vcombine.low %v2179_v36, %v2191_v10  ;;  %v2369_v49 = vcombine.high %v2179_v36, %v2191_v10  ;;  %v2349_v39 = vcombine.high %v6496_v30, %v6500_v43  ;;  %v2345_v38 = vcombine.high %v6503_v12, %v6506_v2 }
 0x3d7   :  { %v2344_v8 = vcombine.low %v6503_v12, %v6506_v2  ;;  %v2348_v6 = vcombine.low %v6496_v30, %v6500_v43  ;;  %v2350_v20 = vcombine.low %v2311_v59, %v2343_v16  ;;  %v2346_v57 = vcombine.low %v2295_v14, %v2327_v51 }
 0x3d8   :  { %v2376_v61 = vrot.slane %v2368_v31, %v6174_v13  ;;  %v2383_v11 = vrot.slane %v2369_v49, %v6174_v13  ;;  %2501 = vrot.lane.b32.xlu0 %v2349_v39, %s5593_s3  ;;  %2489 = vrot.lane.b32.xlu1 %v2345_v38, %s5593_s3  ;;  %v2351_v33 = vcombine.high %v2311_v59, %v2343_v16 }
 0x3d9   :  { %v2211_v46 = vpop.permute.xlu1 %2210  ;;  %v2205_v24 = vpop.permute.xlu0 %2204  ;;  %v2347_v41 = vcombine.high %v2295_v14, %v2327_v51 }
 0x3da   :  { %v2400_v4 = vcombine.low %v2199_v27, %v2211_v46  ;;  %v2401_v15 = vcombine.high %v2199_v27, %v2211_v46  ;;  %v2384_v62 = vcombine.low %v6472_v48, %v2205_v24  ;;  %v2385_v23 = vcombine.high %v6472_v48, %v2205_v24 }
 0x3db   :  { %v2416_v40 = vcombine.low %v2360_v55, %v2376_v61  ;;  %v2432_v28 = vcombine.low %v2367_v5, %v2383_v11  ;;  %v2433_v48 = vcombine.high %v2367_v5, %v2383_v11  ;;  %v2417_v43 = vcombine.high %v2360_v55, %v2376_v61 }
 0x3dc   :  { %v2408_v58 = vrot.slane %v2400_v4, %v6174_v13  ;;  %v2415_v9 = vrot.slane %v2401_v15, %v6174_v13  ;;  %v2392_v47 = vrot.slane %v2384_v62, %v6174_v13  ;;  %v2399_v36 = vrot.slane %v2385_v23, %v6174_v13  ;;  %2505 = vrot.lane.b32.xlu0 %v2350_v20, %s5592_s2 }
 0x3dd   :  { %2493 = vrot.lane.b32.xlu1 %v2346_v57, %s5592_s2  ;;  %v2440_v30 = vrot.slane %v2432_v28, %v6209_v35  ;;  %v2424_v27 = vrot.slane %v2416_v40, %v6209_v35  ;;  %v2447_v11 = vrot.slane %v2433_v48, %v6209_v35  ;;  %v2431_v59 = vrot.slane %v2417_v43, %v6209_v35  ;;  %v3640_v55 = vpop.permute.xlu1 %3639  ;;  %v3652_v5 = vpop.permute.xlu0 %3651 }
 0x3de   :  { %v2448_v37 = vcombine.low %v2392_v47, %v2408_v58  ;;  %v2464_v19 = vcombine.low %v2399_v36, %v2415_v9  ;;  %v2465_v21 = vcombine.high %v2399_v36, %v2415_v9  ;;  %v2449_v32 = vcombine.high %v2392_v47, %v2408_v58 }
 0x3df   :  { %v3662_v48 = vsel %vm1524_vm1, %v3630_v22, %v3640_v55 }
 0x3e0   :  { %2509 = vrot.lane.b32.xlu0 %v2351_v33, %s5595_s17  ;;  %v2472_v26 = vrot.slane %v2464_v19, %v6209_v35  ;;  %v2456_v10 = vrot.slane %v2448_v37, %v6209_v35  ;;  %v2479_v49 = vrot.slane %v2465_v21, %v6209_v35  ;;  %v2463_v16 = vrot.slane %v2449_v32, %v6209_v35 }
 0x3e1   :  { %2497 = vrot.lane.b32.xlu1 %v2347_v41, %s5595_s17  ;;  %v3665_v33 = vsel %vm1524_vm1, %v3634_v1, %v3652_v5 }
 0x3e2   :  { %v2485_v44 = vcombine.high %v2440_v30, %v2472_v26  ;;  %v2481_v31 = vcombine.high %v2424_v27, %v2456_v10  ;;  %v2480_v39 = vcombine.low %v2424_v27, %v2456_v10  ;;  %v2484_v38 = vcombine.low %v2440_v30, %v2472_v26 }
 0x3e3   :  { %v2486_v51 = vcombine.low %v2447_v11, %v2479_v49  ;;  %v2482_v61 = vcombine.low %v2431_v59, %v2463_v16  ;;  %v2487_v46 = vcombine.high %v2447_v11, %v2479_v49  ;;  %v2483_v24 = vcombine.high %v2431_v59, %v2463_v16 }
 0x3e4   :  { %2525 = vrot.lane.b32.xlu0 %v2485_v44, %s5593_s3 }
 0x3e5   :  { %2513 = vrot.lane.b32.xlu1 %v2481_v31, %s5593_s3 }
 0x3e8   :  { %2529 = vrot.lane.b32.xlu0 %v2486_v51, %s5592_s2 }
 0x3e9   :  { %2517 = vrot.lane.b32.xlu1 %v2482_v61, %s5592_s2 }
 0x3ec   :  { %2533 = vrot.lane.b32.xlu0 %v2487_v46, %s5595_s17 }
 0x3ed   :  { %2521 = vrot.lane.b32.xlu1 %v2483_v24, %s5595_s17 }
 0x3f0   :  { %3655 = vrot.lane.b32.xlu0 %v3636_v7, %s5592_s2 }
 0x3f1   :  { %3643 = vrot.lane.b32.xlu1 %v3632_v45, %s5592_s2 }
 0x3f4   :  { %3659 = vrot.lane.b32.xlu0 %v3637_v56, %s5595_s17 }
 0x3f5   :  { %3647 = vrot.lane.b32.xlu1 %v3633_v53, %s5595_s17  ;;  %v6578_v53 = vld [vmem:[%s7385_s4] sm:$0xff] }
 0x44a   :  { %v2490_v20 = vpop.permute.xlu1 %2489  ;;  %v2502_v14 = vpop.permute.xlu0 %2501 }
 0x44b   :  { %v2539_v15 = vsel %vm1524_vm1, %v2348_v6, %v2502_v14  ;;  %v2536_v45 = vsel %vm1524_vm1, %v2344_v8, %v2490_v20  ;;  %v6587_v8 = vld [vmem:[%s7385_s4 + $0x8] sm:$0xff] }
 0x44e   :  { %v2506_v7 = vpop.permute.xlu0 %2505 }
 0x44f   :  { %v2494_v4 = vpop.permute.xlu1 %2493  ;;  %v2540_v42 = vsel %vm1997_vm2, %v2539_v15, %v2506_v7 }
 0x450   :  { %v2537_v56 = vsel %vm1997_vm2, %v2536_v45, %v2494_v4 }
 0x452   :  { %v2510_v0 = vpop.permute.xlu0 %2509 }
 0x453   :  { %v2498_v50 = vpop.permute.xlu1 %2497  ;;  %v2541_v18 = vsel %vm1999_vm3, %v2540_v42, %v2510_v0 }
 0x454   :  { %v2538_v6 = vsel %vm1999_vm3, %v2537_v56, %v2498_v50  ;;  %2554 = vmatprep.subr.mxu1 %v2541_v18 }
 0x455   :  { %2555 = vmatpush1.msra.mxu1 %v2538_v6 }
 0x456   :  { %5150 = vmatmul.mubr.msk.f32.vlgmr.msra.gmra.mrb[20].mxu1 %vm2090_vm4, %v6578_v53  ;;  %v2526_v12 = vpop.permute.xlu0 %2525 }
 0x457   :  { %v2514_v2 = vpop.permute.xlu1 %2513  ;;  %2624 = vmatprep.mubr.f32.mxu1 %v5594_v34  ;;  %v2545_v40 = vsel %vm1524_vm1, %v2484_v38, %v2526_v12 }
 0x458   :  { %v2542_v28 = vsel %vm1524_vm1, %v2480_v39, %v2514_v2 }
 0x45a   :  { %5151 = vmatmul.mubr.msk.f32.gmra.mrb[22].mxu1 %vm2090_vm4, %v6587_v8  ;;  %v2530_v62 = vpop.permute.xlu0 %2529 }
 0x45b   :  { %v2518_v23 = vpop.permute.xlu1 %2517  ;;  %2695 = vmatprep.mubr.f32.mxu1 %v5594_v34  ;;  %v2546_v57 = vsel %vm1997_vm2, %v2545_v40, %v2530_v62 }
 0x45c   :  { %v2543_v9 = vsel %vm1997_vm2, %v2542_v28, %v2518_v23 }
 0x45e   :  { %v2534_v58 = vpop.permute.xlu0 %2533 }
 0x45f   :  { %v2522_v47 = vpop.permute.xlu1 %2521  ;;  %v2547_v36 = vsel %vm1999_vm3, %v2546_v57, %v2534_v58 }
 0x460   :  { %v2544_v37 = vsel %vm1999_vm3, %v2543_v9, %v2522_v47  ;;  %2631 = vmatprep.subr.mxu1 %v2547_v36 }
 0x461   :  { %2632 = vmatpush1.msra.mxu1 %v2544_v37 }
 0x462   :  { %5152 = vmatmul.mubr.msk.f32.vlgmr.msra.gmra.mrb[24].mxu1 %vm2090_vm4, %v6578_v53  ;;  %v3656_v19 = vpop.permute.xlu0 %3655 }
 0x463   :  { %v3644_v21 = vpop.permute.xlu1 %3643  ;;  %2701 = vmatprep.mubr.f32.mxu1 %v5594_v34  ;;  %v3666_v32 = vsel %vm1997_vm2, %v3665_v33, %v3656_v19 }
 0x464   :  { %v3663_v30 = vsel %vm1997_vm2, %v3662_v48, %v3644_v21 }
 0x466   :  { %5153 = vmatmul.mubr.msk.f32.gmra.mrb[26].mxu1 %vm2090_vm4, %v6587_v8  ;;  %v3660_v41 = vpop.permute.xlu0 %3659 }
 0x467   :  { %v3648_v26 = vpop.permute.xlu1 %3647  ;;  %v3667_v27 = vsel %vm1999_vm3, %v3666_v32, %v3660_v41  ;;  %3738 = vmatprep.mubr.f32.mxu1 %v5594_v34 }
 0x468   :  { %v3664_v52 = vsel %vm1999_vm3, %v3663_v30, %v3648_v26  ;;  %3674 = vmatprep.subr.mxu1 %v3667_v27 }
 0x469   :  { %3675 = vmatpush1.msra.mxu1 %v3664_v52 }
 0x46a   :  { %5162 = vmatmul.mubr.msk.f32.vlgmr.msra.gmra.mrb[28].mxu1 %vm2090_vm4, %v6429_v63 }
 0x46b   :  { %3744 = vmatprep.mubr.f32.mxu1 %v5594_v34 }
 0x46e   :  { %5163 = vmatmul.mubr.msk.f32.gmra.mrb[30].mxu1 %vm2090_vm4, %v6437_v3 }
 0x46f   :  { %4195 = vmatprep.mubr.f32.mxu1 %v5594_v34 }
 0x529   :  { %v6622_v60 = vpop.f32.mrb[20].mxu1 }
 0x52a   :  { %v6624_v29 = vpop.f32.mrb[21].mxu1 }
 0x52d   :  { %v6626_v22 = vpop.f32.mrb[22].mxu1 }
 0x52e   :  { %v6628_v54 = vpop.f32.mrb[23].mxu1 }
 0x535   :  { %v6630_v1 = vpop.f32.mrb[24].mxu1 }
 0x536   :  { %v6632_v10 = vpop.f32.mrb[25].mxu1 }
 0x539   :  { %v6634_v63 = vpop.f32.mrb[26].mxu1 }
 0x53a   :  { %v6636_v43 = vpop.f32.mrb[27].mxu1 }
 0x53d   :  { %v3740_v44 = vpop.f32.mrb[28].mxu1 }
 0x53e   :  { %v3741_v3 = vadd.f32 %v3740_v44, %v6450_v25  ;;  %v3742_v31 = vpop.f32.mrb[29].mxu1 }
 0x53f   :  { %v3743_v16 = vadd.f32 %v3742_v31, %v6457_v17 }
 0x540   :  { %3759 = vrot.lane.b32.xlu1 %v3741_v3, %s5592_s2  ;;  %3753 = vrot.lane.b32.xlu0 %v3741_v3, %s5595_s17 }
 0x541   :  { %v3746_v49 = vpop.f32.mrb[30].mxu1 }
 0x542   :  { %v3748_v39 = vpop.f32.mrb[31].mxu1  ;;  %v6647_v38 = vadd.f32 %v3746_v49, %v6450_v25 }
 0x543   :  { %v6654_v11 = vadd.f32 %v3748_v39, %v6457_v17 }
 0x544   :  { %3773 = vrot.lane.b32.xlu1 %v3743_v16, %s5595_s17  ;;  %3765 = vrot.lane.b32.xlu0 %v3741_v3, %s5593_s3 }
 0x548   :  { %3785 = vrot.lane.b32.xlu1 %v3743_v16, %s5593_s3  ;;  %3779 = vrot.lane.b32.xlu0 %v3743_v16, %s5592_s2 }
 0x54c   :  { %3761 = vrot.lane.b32.xlu1 %v6647_v38, %s5592_s2  ;;  %3755 = vrot.lane.b32.xlu0 %v6647_v38, %s5595_s17 }
 0x550   :  { %3775 = vrot.lane.b32.xlu1 %v6654_v11, %s5595_s17  ;;  %3767 = vrot.lane.b32.xlu0 %v6647_v38, %s5593_s3 }
 0x554   :  { %3787 = vrot.lane.b32.xlu1 %v6654_v11, %s5593_s3  ;;  %3781 = vrot.lane.b32.xlu0 %v6654_v11, %s5592_s2 }
 0x5b2   :  { %v3760_v59 = vpop.permute.xlu1 %3759  ;;  %v3754_v51 = vpop.permute.xlu0 %3753 }
 0x5b3   :  { %v3793_v24 = vcombine.low %v3741_v3, %v3760_v59  ;;  %v3794_v55 = vcombine.high %v3741_v3, %v3760_v59 }
 0x5b5   :  { %v3801_v45 = vrot.slane %v3793_v24, %v6174_v13  ;;  %v3808_v42 = vrot.slane %v3794_v55, %v6174_v13 }
 0x5b6   :  { %v3774_v61 = vpop.permute.xlu1 %3773  ;;  %v3766_v46 = vpop.permute.xlu0 %3765 }
 0x5b7   :  { %v3809_v5 = vcombine.low %v3754_v51, %v3766_v46  ;;  %v3810_v20 = vcombine.high %v3754_v51, %v3766_v46 }
 0x5b9   :  { %v3817_v14 = vrot.slane %v3809_v5, %v6174_v13  ;;  %v3824_v7 = vrot.slane %v3810_v20, %v6174_v13 }
 0x5ba   :  { %v3786_v4 = vpop.permute.xlu1 %3785  ;;  %v3780_v15 = vpop.permute.xlu0 %3779 }
 0x5bb   :  { %v3841_v0 = vcombine.low %v3774_v61, %v3786_v4  ;;  %v3842_v56 = vcombine.high %v3774_v61, %v3786_v4  ;;  %v3825_v50 = vcombine.low %v3743_v16, %v3780_v15  ;;  %v3826_v18 = vcombine.high %v3743_v16, %v3780_v15 }
 0x5bc   :  { %v3857_v6 = vcombine.low %v3801_v45, %v3817_v14  ;;  %v3873_v12 = vcombine.low %v3808_v42, %v3824_v7  ;;  %v3858_v36 = vcombine.high %v3801_v45, %v3817_v14  ;;  %v3874_v37 = vcombine.high %v3808_v42, %v3824_v7 }
 0x5bd   :  { %v3849_v2 = vrot.slane %v3841_v0, %v6174_v13  ;;  %v3856_v62 = vrot.slane %v3842_v56, %v6174_v13  ;;  %v3833_v23 = vrot.slane %v3825_v50, %v6174_v13  ;;  %v3840_v40 = vrot.slane %v3826_v18, %v6174_v13 }
 0x5be   :  { %v3762_v28 = vpop.permute.xlu1 %3761  ;;  %v3756_v57 = vpop.permute.xlu0 %3755  ;;  %v6673_v21 = vrot.slane %v3873_v12, %v6209_v35  ;;  %v6680_v30 = vrot.slane %v3857_v6, %v6209_v35  ;;  %v3888_v59 = vrot.slane %v3874_v37, %v6209_v35  ;;  %v3872_v14 = vrot.slane %v3858_v36, %v6209_v35 }
 0x5bf   :  { %v3889_v58 = vcombine.low %v3833_v23, %v3849_v2  ;;  %v3905_v9 = vcombine.low %v3840_v40, %v3856_v62  ;;  %v3906_v47 = vcombine.high %v3840_v40, %v3856_v62  ;;  %v3890_v19 = vcombine.high %v3833_v23, %v3849_v2 }
 0x5c0   :  { %v3929_v33 = vcombine.low %v6647_v38, %v3762_v28  ;;  %v3930_v27 = vcombine.high %v6647_v38, %v3762_v28 }
 0x5c1   :  { %v6677_v41 = vrot.slane %v3905_v9, %v6209_v35  ;;  %v6683_v26 = vrot.slane %v3889_v58, %v6209_v35  ;;  %v3920_v3 = vrot.slane %v3906_v47, %v6209_v35  ;;  %v3904_v51 = vrot.slane %v3890_v19, %v6209_v35 }
 0x5c2   :  { %v3776_v48 = vpop.permute.xlu1 %3775  ;;  %v3768_v32 = vpop.permute.xlu0 %3767  ;;  %v3937_v55 = vrot.slane %v3929_v33, %v6174_v13  ;;  %v3944_v5 = vrot.slane %v3930_v27, %v6174_v13 }
 0x5c3   :  { %v3945_v52 = vcombine.low %v3756_v57, %v3768_v32  ;;  %v3946_v44 = vcombine.high %v3756_v57, %v3768_v32  ;;  %v3926_v31 = vcombine.high %v6673_v21, %v6677_v41  ;;  %v3922_v49 = vcombine.high %v6680_v30, %v6683_v26 }
 0x5c4   :  { %v3921_v46 = vcombine.low %v6680_v30, %v6683_v26  ;;  %v3925_v24 = vcombine.low %v6673_v21, %v6677_v41  ;;  %v3927_v20 = vcombine.low %v3888_v59, %v3920_v3  ;;  %v3923_v56 = vcombine.low %v3872_v14, %v3904_v51 }
 0x5c5   :  { %v3953_v16 = vrot.slane %v3945_v52, %v6174_v13  ;;  %v3960_v39 = vrot.slane %v3946_v44, %v6174_v13  ;;  %4078 = vrot.lane.b32.xlu0 %v3926_v31, %s5593_s3  ;;  %4066 = vrot.lane.b32.xlu1 %v3922_v49, %s5593_s3  ;;  %v3928_v40 = vcombine.high %v3888_v59, %v3920_v3 }
 0x5c6   :  { %v3788_v38 = vpop.permute.xlu1 %3787  ;;  %v3782_v61 = vpop.permute.xlu0 %3781  ;;  %v3924_v57 = vcombine.high %v3872_v14, %v3904_v51  ;;  %v6746_v59 = vadd.f32 %v6622_v60, %v6450_v25  ;;  %v6750_v51 = vadd.f32 %v6626_v22, %v6450_v25  ;;  %v6766_v60 = vadd.f32 %v6624_v29, %v6457_v17 }
 0x5c7   :  { %v3977_v7 = vcombine.low %v3776_v48, %v3788_v38  ;;  %v3978_v4 = vcombine.high %v3776_v48, %v3788_v38  ;;  %v3961_v15 = vcombine.low %v6654_v11, %v3782_v61  ;;  %v3962_v45 = vcombine.high %v6654_v11, %v3782_v61 }
 0x5c8   :  { %v3993_v42 = vcombine.low %v3937_v55, %v3953_v16  ;;  %v4009_v0 = vcombine.low %v3944_v5, %v3960_v39  ;;  %v4010_v11 = vcombine.high %v3944_v5, %v3960_v39  ;;  %v3994_v37 = vcombine.high %v3937_v55, %v3953_v16 }
 0x5c9   :  { %v3985_v50 = vrot.slane %v3977_v7, %v6174_v13  ;;  %v3992_v18 = vrot.slane %v3978_v4, %v6174_v13  ;;  %v3969_v6 = vrot.slane %v3961_v15, %v6174_v13  ;;  %v3976_v12 = vrot.slane %v3962_v45, %v6174_v13  ;;  %4082 = vrot.lane.b32.xlu0 %v3927_v20, %s5592_s2 }
 0x5ca   :  { %4070 = vrot.lane.b32.xlu1 %v3923_v56, %s5592_s2  ;;  %v6714_v58 = vrot.slane %v4009_v0, %v6209_v35  ;;  %v6720_v47 = vrot.slane %v3993_v42, %v6209_v35  ;;  %v4024_v44 = vrot.slane %v4010_v11, %v6209_v35  ;;  %v4008_v3 = vrot.slane %v3994_v37, %v6209_v35 }
 0x5cb   :  { %v4025_v2 = vcombine.low %v3969_v6, %v3985_v50  ;;  %v4041_v62 = vcombine.low %v3976_v12, %v3992_v18  ;;  %v4042_v23 = vcombine.high %v3976_v12, %v3992_v18  ;;  %v4026_v28 = vcombine.high %v3969_v6, %v3985_v50 }
 0x5cc   :  { %v6770_v22 = vadd.f32 %v6628_v54, %v6457_v17  ;;  %v6786_v29 = vadd.f32 %v6630_v1, %v6450_v25  ;;  %v6790_v54 = vadd.f32 %v6634_v63, %v6450_v25  ;;  %v6806_v1 = vadd.f32 %v6632_v10, %v6457_v17 }
 0x5cd   :  { %4086 = vrot.lane.b32.xlu0 %v3928_v40, %s5595_s17  ;;  %v6717_v9 = vrot.slane %v4041_v62, %v6209_v35  ;;  %v6723_v36 = vrot.slane %v4025_v2, %v6209_v35  ;;  %v4056_v48 = vrot.slane %v4042_v23, %v6209_v35  ;;  %v4040_v32 = vrot.slane %v4026_v28, %v6209_v35 }
 0x5ce   :  { %4074 = vrot.lane.b32.xlu1 %v3924_v57, %s5595_s17  ;;  %v6810_v63 = vadd.f32 %v6636_v43, %v6457_v17 }
 0x5cf   :  { %v4062_v19 = vcombine.high %v6714_v58, %v6717_v9  ;;  %v4058_v33 = vcombine.high %v6720_v47, %v6723_v36  ;;  %v4057_v27 = vcombine.low %v6720_v47, %v6723_v36  ;;  %v4061_v52 = vcombine.low %v6714_v58, %v6717_v9 }
 0x5d0   :  { %v4063_v31 = vcombine.low %v4024_v44, %v4056_v48  ;;  %v4059_v49 = vcombine.low %v4008_v3, %v4040_v32  ;;  %v4064_v16 = vcombine.high %v4024_v44, %v4056_v48  ;;  %v4060_v39 = vcombine.high %v4008_v3, %v4040_v32 }
 0x5d1   :  { %4102 = vrot.lane.b32.xlu0 %v4062_v19, %s5593_s3 }
 0x5d2   :  { %4090 = vrot.lane.b32.xlu1 %v4058_v33, %s5593_s3 }
 0x5d5   :  { %4106 = vrot.lane.b32.xlu0 %v4063_v31, %s5592_s2 }
 0x5d6   :  { %4094 = vrot.lane.b32.xlu1 %v4059_v49, %s5592_s2 }
 0x5d9   :  { %4110 = vrot.lane.b32.xlu0 %v4064_v16, %s5595_s17 }
 0x5da   :  { %4098 = vrot.lane.b32.xlu1 %v4060_v39, %s5595_s17 }
 0x5dd   :  { %2710 = vrot.lane.b32.xlu0 %v6746_v59, %s5595_s17 }
 0x5de   :  { %2712 = vrot.lane.b32.xlu1 %v6750_v51, %s5595_s17 }
 0x5e1   :  { %2716 = vrot.lane.b32.xlu0 %v6746_v59, %s5592_s2 }
 0x5e2   :  { %2718 = vrot.lane.b32.xlu1 %v6750_v51, %s5592_s2 }
 0x5e5   :  { %2722 = vrot.lane.b32.xlu0 %v6746_v59, %s5593_s3 }
 0x5e6   :  { %2724 = vrot.lane.b32.xlu1 %v6750_v51, %s5593_s3 }
 0x5e9   :  { %2730 = vrot.lane.b32.xlu0 %v6766_v60, %s5595_s17 }
 0x5ea   :  { %2732 = vrot.lane.b32.xlu1 %v6770_v22, %s5595_s17 }
 0x5ed   :  { %2736 = vrot.lane.b32.xlu0 %v6766_v60, %s5592_s2 }
 0x5ee   :  { %2738 = vrot.lane.b32.xlu1 %v6770_v22, %s5592_s2 }
 0x5f1   :  { %2742 = vrot.lane.b32.xlu0 %v6766_v60, %s5593_s3 }
 0x5f2   :  { %2744 = vrot.lane.b32.xlu1 %v6770_v22, %s5593_s3 }
 0x5f5   :  { %2750 = vrot.lane.b32.xlu0 %v6786_v29, %s5595_s17 }
 0x5f6   :  { %2752 = vrot.lane.b32.xlu1 %v6790_v54, %s5595_s17 }
 0x5f9   :  { %2756 = vrot.lane.b32.xlu0 %v6786_v29, %s5592_s2 }
 0x5fa   :  { %2758 = vrot.lane.b32.xlu1 %v6790_v54, %s5592_s2 }
 0x5fd   :  { %2762 = vrot.lane.b32.xlu0 %v6786_v29, %s5593_s3 }
 0x5fe   :  { %2764 = vrot.lane.b32.xlu1 %v6790_v54, %s5593_s3 }
 0x601   :  { %2770 = vrot.lane.b32.xlu0 %v6806_v1, %s5595_s17 }
 0x602   :  { %2772 = vrot.lane.b32.xlu1 %v6810_v63, %s5595_s17 }
 0x605   :  { %2776 = vrot.lane.b32.xlu0 %v6806_v1, %s5592_s2 }
 0x606   :  { %2778 = vrot.lane.b32.xlu1 %v6810_v63, %s5592_s2 }
 0x609   :  { %2782 = vrot.lane.b32.xlu0 %v6806_v1, %s5593_s3 }
 0x60a   :  { %2784 = vrot.lane.b32.xlu1 %v6810_v63, %s5593_s3 }
 0x637   :  { %v4067_v10 = vpop.permute.xlu1 %4066  ;;  %v4079_v43 = vpop.permute.xlu0 %4078 }
 0x638   :  { %v4116_v55 = vsel %vm1524_vm1, %v3925_v24, %v4079_v43  ;;  %v4113_v5 = vsel %vm1524_vm1, %v3921_v46, %v4067_v10 }
 0x63b   :  { %v4083_v38 = vpop.permute.xlu0 %4082 }
 0x63c   :  { %v4071_v61 = vpop.permute.xlu1 %4070  ;;  %v4117_v20 = vsel %vm1997_vm2, %v4116_v55, %v4083_v38 }
 0x63d   :  { %v4114_v7 = vsel %vm1997_vm2, %v4113_v5, %v4071_v61 }
 0x63f   :  { %v4087_v14 = vpop.permute.xlu0 %4086 }
 0x640   :  { %v4075_v4 = vpop.permute.xlu1 %4074  ;;  %v4118_v15 = vsel %vm1999_vm3, %v4117_v20, %v4087_v14 }
 0x641   :  { %v4115_v45 = vsel %vm1999_vm3, %v4114_v7, %v4075_v4  ;;  %4131 = vmatprep.subr.mxu1 %v4118_v15 }
 0x642   :  { %4132 = vmatpush1.msra.mxu1 %v4115_v45 }
 0x643   :  { %5164 = vmatmul.mubr.msk.f32.vlgmr.msra.gmra.mrb[32].mxu1 %vm2090_vm4, %v6578_v53  ;;  %v4103_v21 = vpop.permute.xlu0 %4102 }
 0x644   :  { %v4091_v41 = vpop.permute.xlu1 %4090  ;;  %4201 = vmatprep.mubr.f32.mxu1 %v5594_v34  ;;  %v4122_v46 = vsel %vm1524_vm1, %v4061_v52, %v4103_v21 }
 0x645   :  { %v4119_v24 = vsel %vm1524_vm1, %v4057_v27, %v4091_v41 }
 0x647   :  { %5165 = vmatmul.mubr.msk.f32.gmra.mrb[34].mxu1 %vm2090_vm4, %v6587_v8  ;;  %v4107_v30 = vpop.permute.xlu0 %4106 }
 0x648   :  { %v4095_v26 = vpop.permute.xlu1 %4094  ;;  %4272 = vmatprep.mubr.f32.mxu1 %v5594_v34  ;;  %v4123_v42 = vsel %vm1997_vm2, %v4122_v46, %v4107_v30 }
 0x649   :  { %v4120_v56 = vsel %vm1997_vm2, %v4119_v24, %v4095_v26 }
 0x64b   :  { %v4111_v0 = vpop.permute.xlu0 %4110 }
 0x64c   :  { %v4099_v50 = vpop.permute.xlu1 %4098  ;;  %v4124_v18 = vsel %vm1999_vm3, %v4123_v42, %v4111_v0 }
 0x64d   :  { %v4121_v6 = vsel %vm1999_vm3, %v4120_v56, %v4099_v50  ;;  %4208 = vmatprep.subr.mxu1 %v4124_v18 }
 0x64e   :  { %4209 = vmatpush1.msra.mxu1 %v4121_v6 }
 0x64f   :  { %5166 = vmatmul.mubr.msk.f32.vlgmr.msra.gmra.mrb[36].mxu1 %vm2090_vm4, %v6578_v53  ;;  %v2711_v12 = vpop.permute.xlu0 %2710 }
 0x650   :  { %v2713_v2 = vpop.permute.xlu1 %2712  ;;  %4278 = vmatprep.mubr.f32.mxu1 %v5594_v34 }
 0x653   :  { %5167 = vmatmul.mubr.msk.f32.gmra.mrb[38].mxu1 %vm2090_vm4, %v6587_v8  ;;  %v2717_v62 = vpop.permute.xlu0 %2716 }
 0x654   :  { %v2719_v23 = vpop.permute.xlu1 %2718  ;;  %v2788_v11 = vcombine.low %v6746_v59, %v2717_v62  ;;  %v2789_v9 = vcombine.high %v6746_v59, %v2717_v62 }
 0x655   :  { %v3060_v53 = vcombine.low %v6750_v51, %v2719_v23  ;;  %v3061_v34 = vcombine.high %v6750_v51, %v2719_v23 }
 0x656   :  { %v2796_v33 = vrot.slane %v2788_v11, %v6174_v13  ;;  %v2803_v27 = vrot.slane %v2789_v9, %v6174_v13 }
 0x657   :  { %v2723_v40 = vpop.permute.xlu0 %2722  ;;  %v3068_v44 = vrot.slane %v3060_v53, %v6174_v13  ;;  %v3075_v49 = vrot.slane %v3061_v34, %v6174_v13 }
 0x658   :  { %v2725_v28 = vpop.permute.xlu1 %2724  ;;  %v2804_v57 = vcombine.low %v2711_v12, %v2723_v40  ;;  %v2805_v58 = vcombine.high %v2711_v12, %v2723_v40 }
 0x659   :  { %v3076_v47 = vcombine.low %v2713_v2, %v2725_v28  ;;  %v3077_v36 = vcombine.high %v2713_v2, %v2725_v28 }
 0x65a   :  { %v2812_v37 = vrot.slane %v2804_v57, %v6174_v13  ;;  %v2819_v8 = vrot.slane %v2805_v58, %v6174_v13 }
 0x65b   :  { %v2731_v19 = vpop.permute.xlu0 %2730  ;;  %v3084_v48 = vrot.slane %v3076_v47, %v6174_v13  ;;  %v3091_v52 = vrot.slane %v3077_v36, %v6174_v13 }
 0x65c   :  { %v2733_v32 = vpop.permute.xlu1 %2732  ;;  %v2852_v3 = vcombine.low %v2796_v33, %v2812_v37  ;;  %v2853_v31 = vcombine.high %v2796_v33, %v2812_v37  ;;  %v2868_v16 = vcombine.low %v2803_v27, %v2819_v8  ;;  %v2869_v39 = vcombine.high %v2803_v27, %v2819_v8 }
 0x65d   :  { %v3124_v51 = vcombine.low %v3068_v44, %v3084_v48  ;;  %v3125_v10 = vcombine.high %v3068_v44, %v3084_v48  ;;  %v3140_v38 = vcombine.low %v3075_v49, %v3091_v52  ;;  %v3141_v61 = vcombine.high %v3075_v49, %v3091_v52 }
 0x65e   :  { %v2860_v55 = vrot.slane %v2852_v3, %v6209_v35  ;;  %v2867_v5 = vrot.slane %v2853_v31, %v6209_v35  ;;  %v6876_v7 = vrot.slane %v2868_v16, %v6209_v35  ;;  %v6879_v4 = vrot.slane %v2869_v39, %v6209_v35 }
 0x65f   :  { %v2737_v59 = vpop.permute.xlu0 %2736  ;;  %v3132_v41 = vrot.slane %v3124_v51, %v6209_v35  ;;  %v3139_v30 = vrot.slane %v3125_v10, %v6209_v35  ;;  %v3155_v42 = vrot.slane %v3141_v61, %v6209_v35 }
 0x660   :  { %v2739_v43 = vpop.permute.xlu1 %2738  ;;  %v2820_v20 = vcombine.low %v6766_v60, %v2737_v59  ;;  %v2821_v14 = vcombine.high %v6766_v60, %v2737_v59  ;;  %v3148_v60 = vrot.slane %v3140_v38, %v6209_v35 }
 0x661   :  { %v3092_v15 = vcombine.low %v6770_v22, %v2739_v43  ;;  %v3093_v45 = vcombine.high %v6770_v22, %v2739_v43 }
 0x662   :  { %v2828_v50 = vrot.slane %v2820_v20, %v6174_v13  ;;  %v2835_v18 = vrot.slane %v2821_v14, %v6174_v13 }
 0x663   :  { %v2743_v21 = vpop.permute.xlu0 %2742  ;;  %v3100_v12 = vrot.slane %v3092_v15, %v6174_v13  ;;  %v3107_v2 = vrot.slane %v3093_v45, %v6174_v13 }
 0x664   :  { %v2745_v26 = vpop.permute.xlu1 %2744  ;;  %v2836_v46 = vcombine.low %v2731_v19, %v2743_v21  ;;  %v2837_v24 = vcombine.high %v2731_v19, %v2743_v21 }
 0x665   :  { %v3108_v0 = vcombine.low %v2733_v32, %v2745_v26  ;;  %v3109_v56 = vcombine.high %v2733_v32, %v2745_v26 }
 0x666   :  { %v2844_v22 = vrot.slane %v2836_v46, %v6174_v13  ;;  %v2851_v6 = vrot.slane %v2837_v24, %v6174_v13 }
 0x667   :  { %v3116_v62 = vrot.slane %v3108_v0, %v6174_v13  ;;  %v3123_v23 = vrot.slane %v3109_v56, %v6174_v13  ;;  %v6895_v40 = vpop.permute.xlu0 %2750 }
 0x668   :  { %v2884_v11 = vcombine.low %v2828_v50, %v2844_v22  ;;  %v2885_v28 = vcombine.high %v2828_v50, %v2844_v22  ;;  %v2900_v57 = vcombine.low %v2835_v18, %v2851_v6  ;;  %v2901_v58 = vcombine.high %v2835_v18, %v2851_v6  ;;  %v2753_v9 = vpop.permute.xlu1 %2752 }
 0x669   :  { %v3156_v47 = vcombine.low %v3100_v12, %v3116_v62  ;;  %v3157_v36 = vcombine.high %v3100_v12, %v3116_v62  ;;  %v3172_v53 = vcombine.low %v3107_v2, %v3123_v23  ;;  %v3173_v37 = vcombine.high %v3107_v2, %v3123_v23 }
 0x66a   :  { %v2892_v34 = vrot.slane %v2884_v11, %v6209_v35  ;;  %v2899_v8 = vrot.slane %v2885_v28, %v6209_v35  ;;  %v2908_v19 = vrot.slane %v2900_v57, %v6209_v35  ;;  %v2915_v33 = vrot.slane %v2901_v58, %v6209_v35 }
 0x66b   :  { %v3164_v48 = vrot.slane %v3156_v47, %v6209_v35  ;;  %v3171_v32 = vrot.slane %v3157_v36, %v6209_v35  ;;  %v3180_v27 = vrot.slane %v3172_v53, %v6209_v35  ;;  %v3187_v52 = vrot.slane %v3173_v37, %v6209_v35  ;;  %v2757_v44 = vpop.permute.xlu0 %2756 }
 0x66c   :  { %v2916_v3 = vcombine.low %v2860_v55, %v2892_v34  ;;  %v2917_v31 = vcombine.high %v2860_v55, %v2892_v34  ;;  %v2918_v49 = vcombine.low %v2867_v5, %v2899_v8  ;;  %v2919_v16 = vcombine.high %v2867_v5, %v2899_v8  ;;  %v2759_v39 = vpop.permute.xlu1 %2758 }
 0x66d   :  { %v3188_v59 = vcombine.low %v3132_v41, %v3164_v48  ;;  %v3189_v51 = vcombine.high %v3132_v41, %v3164_v48  ;;  %v3190_v10 = vcombine.low %v3139_v30, %v3171_v32  ;;  %v3191_v43 = vcombine.high %v3139_v30, %v3171_v32 }
 0x66e   :  { %v3192_v38 = vcombine.low %v3148_v60, %v3180_v27  ;;  %v3193_v61 = vcombine.high %v3148_v60, %v3180_v27  ;;  %v3194_v20 = vcombine.low %v3155_v42, %v3187_v52  ;;  %v3195_v14 = vcombine.high %v3155_v42, %v3187_v52  ;;  %3332 = vst.msk [vmem:[%s7386_s6] sm:$0xff] %vm1524_vm1, %v2916_v3 }
 0x66f   :  { %3334 = vst.msk [vmem:[%s7386_s6 + $0x10] sm:$0xff] %vm1524_vm1, %v2917_v31  ;;  %3336 = vst.msk [vmem:[%s7386_s6 + $0x20] sm:$0xff] %vm1524_vm1, %v2918_v49  ;;  %v2920_v55 = vcombine.low %v6876_v7, %v2908_v19  ;;  %v2921_v5 = vcombine.high %v6876_v7, %v2908_v19  ;;  %v2922_v15 = vcombine.low %v6879_v4, %v2915_v33  ;;  %v2763_v21 = vpop.permute.xlu0 %2762 }
 0x670   :  { %3338 = vst.msk [vmem:[%s7386_s6 + $0x30] sm:$0xff] %vm1524_vm1, %v2919_v16  ;;  %3348 = vst.msk [vmem:[%s7386_s6 + $0x80] sm:$0xff] %vm1524_vm1, %v3188_v59  ;;  %v2923_v45 = vcombine.high %v6879_v4, %v2915_v33  ;;  %v3196_v7 = vcombine.low %v6790_v54, %v2759_v39  ;;  %v3197_v4 = vcombine.high %v6790_v54, %v2759_v39  ;;  %v2765_v41 = vpop.permute.xlu1 %2764 }
 0x671   :  { %3350 = vst.msk [vmem:[%s7386_s6 + $0x90] sm:$0xff] %vm1524_vm1, %v3189_v51  ;;  %3352 = vst.msk [vmem:[%s7386_s6 + $0xa0] sm:$0xff] %vm1524_vm1, %v3190_v10  ;;  %v3212_v54 = vcombine.low %v2753_v9, %v2765_v41  ;;  %v3213_v30 = vcombine.high %v2753_v9, %v2765_v41  ;;  %v2940_v26 = vcombine.low %v6895_v40, %v2763_v21 }
 0x672   :  { %3354 = vst.msk [vmem:[%s7386_s6 + $0xb0] sm:$0xff] %vm1524_vm1, %v3191_v43  ;;  %3356 = vst.msk [vmem:[%s7386_s6 + $0xc0] sm:$0xff] %vm1524_vm1, %v3192_v38  ;;  %v2941_v46 = vcombine.high %v6895_v40, %v2763_v21  ;;  %v2924_v24 = vcombine.low %v6786_v29, %v2757_v44  ;;  %v2925_v60 = vcombine.high %v6786_v29, %v2757_v44 }
 0x673   :  { %3358 = vst.msk [vmem:[%s7386_s6 + $0xd0] sm:$0xff] %vm1524_vm1, %v3193_v61  ;;  %3360 = vst.msk [vmem:[%s7386_s6 + $0xe0] sm:$0xff] %vm1524_vm1, %v3194_v20  ;;  %v3220_v42 = vrot.slane %v3212_v54, %v6174_v13  ;;  %v3227_v0 = vrot.slane %v3213_v30, %v6174_v13  ;;  %v2771_v56 = vpop.permute.xlu0 %2770  ;;  %v3204_v50 = vrot.slane %v3196_v7, %v6174_v13 }
 0x674   :  { %3362 = vst.msk [vmem:[%s7386_s6 + $0xf0] sm:$0xff] %vm1524_vm1, %v3195_v14  ;;  %3340 = vst.msk [vmem:[%s7386_s6 + $0x40] sm:$0xff] %vm1524_vm1, %v2920_v55  ;;  %v2948_v18 = vrot.slane %v2940_v26, %v6174_v13  ;;  %v2773_v22 = vpop.permute.xlu1 %2772  ;;  %v3211_v6 = vrot.slane %v3197_v4, %v6174_v13  ;;  %v2955_v12 = vrot.slane %v2941_v46, %v6174_v13 }
 0x675   :  { %3342 = vst.msk [vmem:[%s7386_s6 + $0x50] sm:$0xff] %vm1524_vm1, %v2921_v5  ;;  %3344 = vst.msk [vmem:[%s7386_s6 + $0x60] sm:$0xff] %vm1524_vm1, %v2922_v15  ;;  %v2932_v2 = vrot.slane %v2924_v24, %v6174_v13  ;;  %v3260_v62 = vcombine.low %v3204_v50, %v3220_v42  ;;  %v3261_v23 = vcombine.high %v3204_v50, %v3220_v42 }
 0x676   :  { %3346 = vst.msk [vmem:[%s7386_s6 + $0x70] sm:$0xff] %vm1524_vm1, %v2923_v45  ;;  %v2939_v29 = vrot.slane %v2925_v60, %v6174_v13  ;;  %v3276_v40 = vcombine.low %v3211_v6, %v3227_v0  ;;  %v3277_v11 = vcombine.high %v3211_v6, %v3227_v0 }
 0x677   :  { %v2777_v28 = vpop.permute.xlu0 %2776  ;;  %v2988_v57 = vcombine.low %v2932_v2, %v2948_v18  ;;  %v2989_v58 = vcombine.high %v2932_v2, %v2948_v18  ;;  %v3268_v53 = vrot.slane %v3260_v62, %v6209_v35  ;;  %v3275_v37 = vrot.slane %v3261_v23, %v6209_v35 }
 0x678   :  { %v2779_v9 = vpop.permute.xlu1 %2778  ;;  %v3004_v47 = vcombine.low %v2939_v29, %v2955_v12  ;;  %v3005_v36 = vcombine.high %v2939_v29, %v2955_v12  ;;  %v2956_v34 = vcombine.low %v6806_v1, %v2777_v28  ;;  %v2957_v8 = vcombine.high %v6806_v1, %v2777_v28 }
 0x679   :  { %v6992_v19 = vrot.slane %v3276_v40, %v6209_v35  ;;  %v6995_v33 = vrot.slane %v3277_v11, %v6209_v35  ;;  %v3228_v48 = vcombine.low %v6810_v63, %v2779_v9  ;;  %v3229_v32 = vcombine.high %v6810_v63, %v2779_v9 }
 0x67a   :  { %v2996_v52 = vrot.slane %v2988_v57, %v6209_v35  ;;  %v3003_v44 = vrot.slane %v2989_v58, %v6209_v35  ;;  %v3012_v1 = vrot.slane %v3004_v47, %v6209_v35  ;;  %v3019_v16 = vrot.slane %v3005_v36, %v6209_v35 }
 0x67b   :  { %v2783_v27 = vpop.permute.xlu0 %2782  ;;  %v2964_v51 = vrot.slane %v2956_v34, %v6174_v13  ;;  %v2971_v10 = vrot.slane %v2957_v8, %v6174_v13  ;;  %v3236_v38 = vrot.slane %v3228_v48, %v6174_v13  ;;  %v3243_v61 = vrot.slane %v3229_v32, %v6174_v13 }
 0x67c   :  { %v2785_v3 = vpop.permute.xlu1 %2784  ;;  %v2972_v31 = vcombine.low %v2771_v56, %v2783_v27  ;;  %v2973_v49 = vcombine.high %v2771_v56, %v2783_v27 }
 0x67d   :  { %v3244_v39 = vcombine.low %v2773_v22, %v2785_v3  ;;  %v3245_v59 = vcombine.high %v2773_v22, %v2785_v3 }
 0x67e   :  { %v2980_v63 = vrot.slane %v2972_v31, %v6174_v13  ;;  %v2987_v43 = vrot.slane %v2973_v49, %v6174_v13 }
 0x67f   :  { %v3252_v20 = vrot.slane %v3244_v39, %v6174_v13  ;;  %v3259_v14 = vrot.slane %v3245_v59, %v6174_v13 }
 0x680   :  { %v3020_v55 = vcombine.low %v2964_v51, %v2980_v63  ;;  %v3021_v5 = vcombine.high %v2964_v51, %v2980_v63  ;;  %v3036_v15 = vcombine.low %v2971_v10, %v2987_v43  ;;  %v3037_v45 = vcombine.high %v2971_v10, %v2987_v43 }
 0x681   :  { %v3292_v21 = vcombine.low %v3236_v38, %v3252_v20  ;;  %v3293_v7 = vcombine.high %v3236_v38, %v3252_v20  ;;  %v3308_v4 = vcombine.low %v3243_v61, %v3259_v14  ;;  %v3309_v41 = vcombine.high %v3243_v61, %v3259_v14 }
 0x682   :  { %v3028_v54 = vrot.slane %v3020_v55, %v6209_v35  ;;  %v3035_v30 = vrot.slane %v3021_v5, %v6209_v35  ;;  %v3044_v26 = vrot.slane %v3036_v15, %v6209_v35  ;;  %v3051_v46 = vrot.slane %v3037_v45, %v6209_v35 }
 0x683   :  { %v3300_v24 = vrot.slane %v3292_v21, %v6209_v35  ;;  %v3307_v60 = vrot.slane %v3293_v7, %v6209_v35  ;;  %v3316_v42 = vrot.slane %v3308_v4, %v6209_v35  ;;  %v3323_v0 = vrot.slane %v3309_v41, %v6209_v35 }
 0x684   :  { %v3052_v56 = vcombine.low %v2996_v52, %v3028_v54  ;;  %v3053_v50 = vcombine.high %v2996_v52, %v3028_v54  ;;  %v3054_v18 = vcombine.low %v3003_v44, %v3035_v30  ;;  %v3055_v22 = vcombine.high %v3003_v44, %v3035_v30 }
 0x685   :  { %v3324_v6 = vcombine.low %v3268_v53, %v3300_v24  ;;  %v3325_v12 = vcombine.high %v3268_v53, %v3300_v24  ;;  %v3326_v2 = vcombine.low %v3275_v37, %v3307_v60  ;;  %v3327_v62 = vcombine.high %v3275_v37, %v3307_v60 }
 0x686   :  { %v3328_v23 = vcombine.low %v6992_v19, %v3316_v42  ;;  %v3329_v29 = vcombine.high %v6992_v19, %v3316_v42  ;;  %v3330_v40 = vcombine.low %v6995_v33, %v3323_v0  ;;  %v3331_v11 = vcombine.high %v6995_v33, %v3323_v0  ;;  %3333 = vst.msk [vmem:[%s7386_s6 + $0x8] sm:$0xff] %vm1524_vm1, %v3052_v56 }
 0x687   :  { %3335 = vst.msk [vmem:[%s7386_s6 + $0x18] sm:$0xff] %vm1524_vm1, %v3053_v50  ;;  %3337 = vst.msk [vmem:[%s7386_s6 + $0x28] sm:$0xff] %vm1524_vm1, %v3054_v18  ;;  %v3056_v28 = vcombine.low %v3012_v1, %v3044_v26  ;;  %v3057_v57 = vcombine.high %v3012_v1, %v3044_v26  ;;  %v3058_v58 = vcombine.low %v3019_v16, %v3051_v46 }
 0x688   :  { %3339 = vst.msk [vmem:[%s7386_s6 + $0x38] sm:$0xff] %vm1524_vm1, %v3055_v22  ;;  %3349 = vst.msk [vmem:[%s7386_s6 + $0x88] sm:$0xff] %vm1524_vm1, %v3324_v6  ;;  %v3059_v9 = vcombine.high %v3019_v16, %v3051_v46 }
 0x689   :  { %3351 = vst.msk [vmem:[%s7386_s6 + $0x98] sm:$0xff] %vm1524_vm1, %v3325_v12  ;;  %3353 = vst.msk [vmem:[%s7386_s6 + $0xa8] sm:$0xff] %vm1524_vm1, %v3326_v2 }
 0x68a   :  { %3355 = vst.msk [vmem:[%s7386_s6 + $0xb8] sm:$0xff] %vm1524_vm1, %v3327_v62  ;;  %3357 = vst.msk [vmem:[%s7386_s6 + $0xc8] sm:$0xff] %vm1524_vm1, %v3328_v23 }
 0x68b   :  { %3359 = vst.msk [vmem:[%s7386_s6 + $0xd8] sm:$0xff] %vm1524_vm1, %v3329_v29  ;;  %3361 = vst.msk [vmem:[%s7386_s6 + $0xe8] sm:$0xff] %vm1524_vm1, %v3330_v40 }
 0x68c   :  { %3363 = vst.msk [vmem:[%s7386_s6 + $0xf8] sm:$0xff] %vm1524_vm1, %v3331_v11  ;;  %3341 = vst.msk [vmem:[%s7386_s6 + $0x48] sm:$0xff] %vm1524_vm1, %v3056_v28 }
 0x68d   :  { %3343 = vst.msk [vmem:[%s7386_s6 + $0x58] sm:$0xff] %vm1524_vm1, %v3057_v57  ;;  %3345 = vst.msk [vmem:[%s7386_s6 + $0x68] sm:$0xff] %vm1524_vm1, %v3058_v58 }
 0x68e   :  { %3347 = vst.msk [vmem:[%s7386_s6 + $0x78] sm:$0xff] %vm1524_vm1, %v3059_v9 }
 0x716   :  { %v4197_v47 = vpop.f32.mrb[32].mxu1 }
 0x717   :  { %v4198_v36 = vadd.f32 %v4197_v47, %v6450_v25  ;;  %v4199_v53 = vpop.f32.mrb[33].mxu1 }
 0x718   :  { %v7099_v33 = vadd.f32 %v4199_v53, %v6457_v17 }
 0x719   :  { %4287 = vrot.lane.b32.xlu0 %v4198_v36, %s5595_s17 }
 0x71a   :  { %v4203_v37 = vpop.f32.mrb[34].mxu1 }
 0x71b   :  { %v7090_v34 = vadd.f32 %v4203_v37, %v6450_v25  ;;  %v4205_v8 = vpop.f32.mrb[35].mxu1 }
 0x71c   :  { %v7106_v27 = vadd.f32 %v4205_v8, %v6457_v17 }
 0x71d   :  { %4289 = vrot.lane.b32.xlu1 %v7090_v34, %s5595_s17  ;;  %4293 = vrot.lane.b32.xlu0 %v4198_v36, %s5592_s2 }
 0x721   :  { %4295 = vrot.lane.b32.xlu1 %v7090_v34, %s5592_s2  ;;  %4299 = vrot.lane.b32.xlu0 %v4198_v36, %s5593_s3 }
 0x722   :  { %v4274_v19 = vpop.f32.mrb[36].mxu1 }
 0x723   :  { %v4276_v48 = vpop.f32.mrb[37].mxu1  ;;  %v7117_v44 = vadd.f32 %v4274_v19, %v6450_v25 }
 0x724   :  { %v7135_v31 = vadd.f32 %v4276_v48, %v6457_v17 }
 0x725   :  { %4301 = vrot.lane.b32.xlu1 %v7090_v34, %s5593_s3  ;;  %4307 = vrot.lane.b32.xlu0 %v7099_v33, %s5595_s17 }
 0x726   :  { %v4280_v32 = vpop.f32.mrb[38].mxu1 }
 0x727   :  { %v4282_v52 = vpop.f32.mrb[39].mxu1  ;;  %v7124_v3 = vadd.f32 %v4280_v32, %v6450_v25 }
 0x728   :  { %v7142_v25 = vadd.f32 %v4282_v52, %v6457_v17 }
 0x729   :  { %4309 = vrot.lane.b32.xlu1 %v7106_v27, %s5595_s17  ;;  %4313 = vrot.lane.b32.xlu0 %v7099_v33, %s5592_s2 }
 0x72d   :  { %4315 = vrot.lane.b32.xlu1 %v7106_v27, %s5592_s2  ;;  %4319 = vrot.lane.b32.xlu0 %v7099_v33, %s5593_s3 }
 0x731   :  { %4321 = vrot.lane.b32.xlu1 %v7106_v27, %s5593_s3  ;;  %4327 = vrot.lane.b32.xlu0 %v7117_v44, %s5595_s17 }
 0x735   :  { %4329 = vrot.lane.b32.xlu1 %v7124_v3, %s5595_s17  ;;  %4333 = vrot.lane.b32.xlu0 %v7117_v44, %s5592_s2 }
 0x739   :  { %4335 = vrot.lane.b32.xlu1 %v7124_v3, %s5592_s2  ;;  %4339 = vrot.lane.b32.xlu0 %v7117_v44, %s5593_s3 }
 0x73d   :  { %4341 = vrot.lane.b32.xlu1 %v7124_v3, %s5593_s3  ;;  %4347 = vrot.lane.b32.xlu0 %v7135_v31, %s5595_s17 }
 0x741   :  { %4349 = vrot.lane.b32.xlu1 %v7142_v25, %s5595_s17  ;;  %4353 = vrot.lane.b32.xlu0 %v7135_v31, %s5592_s2 }
 0x745   :  { %4355 = vrot.lane.b32.xlu1 %v7142_v25, %s5592_s2  ;;  %4359 = vrot.lane.b32.xlu0 %v7135_v31, %s5593_s3 }
 0x749   :  { %4361 = vrot.lane.b32.xlu1 %v7142_v25, %s5593_s3 }
 0x78b   :  { %v4288_v49 = vpop.permute.xlu0 %4287 }
 0x78f   :  { %v4290_v1 = vpop.permute.xlu1 %4289  ;;  %v4294_v16 = vpop.permute.xlu0 %4293 }
 0x790   :  { %v4365_v10 = vcombine.low %v4198_v36, %v4294_v16  ;;  %v4366_v63 = vcombine.high %v4198_v36, %v4294_v16 }
 0x792   :  { %v4373_v14 = vrot.slane %v4365_v10, %v6174_v13  ;;  %v4380_v55 = vrot.slane %v4366_v63, %v6174_v13 }
 0x793   :  { %v4296_v17 = vpop.permute.xlu1 %4295  ;;  %v4300_v39 = vpop.permute.xlu0 %4299 }
 0x794   :  { %v4381_v59 = vcombine.low %v4288_v49, %v4300_v39  ;;  %v4382_v51 = vcombine.high %v4288_v49, %v4300_v39  ;;  %v4637_v5 = vcombine.low %v7090_v34, %v4296_v17  ;;  %v4638_v7 = vcombine.high %v7090_v34, %v4296_v17 }
 0x796   :  { %v4389_v61 = vrot.slane %v4381_v59, %v6174_v13  ;;  %v4396_v20 = vrot.slane %v4382_v51, %v6174_v13  ;;  %v4645_v60 = vrot.slane %v4637_v5, %v6174_v13  ;;  %v7165_v50 = vrot.slane %v4638_v7, %v6174_v13 }
 0x797   :  { %v4302_v43 = vpop.permute.xlu1 %4301  ;;  %v4308_v38 = vpop.permute.xlu0 %4307 }
 0x798   :  { %v4653_v15 = vcombine.low %v4290_v1, %v4302_v43  ;;  %v4429_v4 = vcombine.low %v4373_v14, %v4389_v61  ;;  %v4430_v41 = vcombine.high %v4373_v14, %v4389_v61  ;;  %v4445_v54 = vcombine.low %v4380_v55, %v4396_v20 }
 0x799   :  { %v4446_v30 = vcombine.high %v4380_v55, %v4396_v20  ;;  %v4654_v26 = vcombine.high %v4290_v1, %v4302_v43 }
 0x79a   :  { %v4661_v42 = vrot.slane %v4653_v15, %v6174_v13  ;;  %v4437_v18 = vrot.slane %v4429_v4, %v6209_v35  ;;  %v4444_v12 = vrot.slane %v4430_v41, %v6209_v35  ;;  %v4453_v2 = vrot.slane %v4445_v54, %v6209_v35 }
 0x79b   :  { %v4310_v45 = vpop.permute.xlu1 %4309  ;;  %v4314_v21 = vpop.permute.xlu0 %4313  ;;  %v4460_v62 = vrot.slane %v4446_v30, %v6209_v35  ;;  %v4668_v23 = vrot.slane %v4654_v26, %v6174_v13 }
 0x79c   :  { %v4397_v46 = vcombine.low %v7099_v33, %v4314_v21  ;;  %v4398_v24 = vcombine.high %v7099_v33, %v4314_v21  ;;  %v4701_v57 = vcombine.low %v4645_v60, %v4661_v42  ;;  %v4702_v58 = vcombine.high %v4645_v60, %v4661_v42 }
 0x79d   :  { %v4717_v33 = vcombine.low %v7165_v50, %v4668_v23  ;;  %v4718_v48 = vcombine.high %v7165_v50, %v4668_v23 }
 0x79e   :  { %v4405_v29 = vrot.slane %v4397_v46, %v6174_v13  ;;  %v4412_v40 = vrot.slane %v4398_v24, %v6174_v13  ;;  %v4709_v41 = vrot.slane %v4701_v57, %v6209_v35  ;;  %v4716_v54 = vrot.slane %v4702_v58, %v6209_v35 }
 0x79f   :  { %v4316_v0 = vpop.permute.xlu1 %4315  ;;  %v4320_v56 = vpop.permute.xlu0 %4319 }
 0x7a0   :  { %v4413_v22 = vcombine.low %v4308_v38, %v4320_v56  ;;  %v4414_v6 = vcombine.high %v4308_v38, %v4320_v56  ;;  %v4669_v9 = vcombine.low %v7106_v27, %v4316_v0  ;;  %v4670_v47 = vcombine.high %v7106_v27, %v4316_v0 }
 0x7a1   :  { %v4725_v0 = vrot.slane %v4717_v33, %v6209_v35  ;;  %v4732_v56 = vrot.slane %v4718_v48, %v6209_v35 }
 0x7a2   :  { %v4421_v11 = vrot.slane %v4413_v22, %v6174_v13  ;;  %v4428_v28 = vrot.slane %v4414_v6, %v6174_v13  ;;  %v4677_v17 = vrot.slane %v4669_v9, %v6174_v13  ;;  %v4684_v39 = vrot.slane %v4670_v47, %v6174_v13 }
 0x7a3   :  { %v4322_v36 = vpop.permute.xlu1 %4321  ;;  %v7178_v53 = vpop.permute.xlu0 %4327 }
 0x7a4   :  { %v4461_v37 = vcombine.low %v4405_v29, %v4421_v11  ;;  %v4462_v34 = vcombine.high %v4405_v29, %v4421_v11  ;;  %v4477_v8 = vcombine.low %v4412_v40, %v4428_v28  ;;  %v4478_v19 = vcombine.high %v4412_v40, %v4428_v28 }
 0x7a5   :  { %v4685_v32 = vcombine.low %v4310_v45, %v4322_v36  ;;  %v4686_v52 = vcombine.high %v4310_v45, %v4322_v36 }
 0x7a6   :  { %v4469_v49 = vrot.slane %v4461_v37, %v6209_v35  ;;  %v4476_v1 = vrot.slane %v4462_v34, %v6209_v35  ;;  %v4485_v16 = vrot.slane %v4477_v8, %v6209_v35  ;;  %v4492_v27 = vrot.slane %v4478_v19, %v6209_v35 }
 0x7a7   :  { %v4693_v59 = vrot.slane %v4685_v32, %v6174_v13  ;;  %v4700_v51 = vrot.slane %v4686_v52, %v6174_v13  ;;  %v7190_v10 = vpop.permute.xlu1 %4329  ;;  %v7192_v63 = vpop.permute.xlu0 %4333 }
 0x7a8   :  { %v4493_v43 = vcombine.low %v4437_v18, %v4469_v49  ;;  %v4494_v38 = vcombine.high %v4437_v18, %v4469_v49  ;;  %v4495_v61 = vcombine.low %v4444_v12, %v4476_v1  ;;  %v4496_v20 = vcombine.high %v4444_v12, %v4476_v1 }
 0x7a9   :  { %v4497_v14 = vcombine.low %v4453_v2, %v4485_v16  ;;  %v4498_v55 = vcombine.high %v4453_v2, %v4485_v16  ;;  %v4499_v5 = vcombine.low %v4460_v62, %v4492_v27  ;;  %v4500_v15 = vcombine.high %v4460_v62, %v4492_v27 }
 0x7aa   :  { %5168 = vst.msk [vmem:[%s7386_s6 + $0x100] sm:$0xff] %vm1524_vm1, %v4493_v43  ;;  %5170 = vst.msk [vmem:[%s7386_s6 + $0x110] sm:$0xff] %vm1524_vm1, %v4494_v38  ;;  %v4733_v45 = vcombine.low %v4677_v17, %v4693_v59  ;;  %v4734_v21 = vcombine.high %v4677_v17, %v4693_v59  ;;  %v4749_v7 = vcombine.low %v4684_v39, %v4700_v51 }
 0x7ab   :  { %5172 = vst.msk [vmem:[%s7386_s6 + $0x120] sm:$0xff] %vm1524_vm1, %v4495_v61  ;;  %5174 = vst.msk [vmem:[%s7386_s6 + $0x130] sm:$0xff] %vm1524_vm1, %v4496_v20  ;;  %v4750_v4 = vcombine.high %v4684_v39, %v4700_v51  ;;  %v4336_v30 = vpop.permute.xlu1 %4335  ;;  %v4340_v26 = vpop.permute.xlu0 %4339  ;;  %v4501_v50 = vcombine.low %v7117_v44, %v7192_v63  ;;  %v4502_v28 = vcombine.high %v7117_v44, %v7192_v63 }
 0x7ac   :  { %5176 = vst.msk [vmem:[%s7386_s6 + $0x140] sm:$0xff] %vm1524_vm1, %v4497_v14  ;;  %5178 = vst.msk [vmem:[%s7386_s6 + $0x150] sm:$0xff] %vm1524_vm1, %v4498_v55  ;;  %v4741_v46 = vrot.slane %v4733_v45, %v6209_v35  ;;  %v4748_v24 = vrot.slane %v4734_v21, %v6209_v35  ;;  %v4757_v60 = vrot.slane %v4749_v7, %v6209_v35 }
 0x7ad   :  { %5180 = vst.msk [vmem:[%s7386_s6 + $0x160] sm:$0xff] %vm1524_vm1, %v4499_v5  ;;  %5182 = vst.msk [vmem:[%s7386_s6 + $0x170] sm:$0xff] %vm1524_vm1, %v4500_v15  ;;  %v4764_v42 = vrot.slane %v4750_v4, %v6209_v35  ;;  %v4517_v57 = vcombine.low %v7178_v53, %v4340_v26  ;;  %v4518_v58 = vcombine.high %v7178_v53, %v4340_v26 }
 0x7ae   :  { %v4765_v18 = vcombine.low %v4709_v41, %v4741_v46  ;;  %v4766_v22 = vcombine.high %v4709_v41, %v4741_v46  ;;  %v4767_v6 = vcombine.low %v4716_v54, %v4748_v24  ;;  %v4768_v12 = vcombine.high %v4716_v54, %v4748_v24 }
 0x7af   :  { %v4769_v2 = vcombine.low %v4725_v0, %v4757_v60  ;;  %v4770_v62 = vcombine.high %v4725_v0, %v4757_v60  ;;  %v4771_v23 = vcombine.low %v4732_v56, %v4764_v42  ;;  %v4772_v29 = vcombine.high %v4732_v56, %v4764_v42  ;;  %v4342_v40 = vpop.permute.xlu1 %4341  ;;  %v4348_v11 = vpop.permute.xlu0 %4347 }
 0x7b0   :  { %5184 = vst.msk [vmem:[%s7386_s6 + $0x180] sm:$0xff] %vm1524_vm1, %v4765_v18  ;;  %5186 = vst.msk [vmem:[%s7386_s6 + $0x190] sm:$0xff] %vm1524_vm1, %v4766_v22  ;;  %v4773_v44 = vcombine.low %v7124_v3, %v4336_v30  ;;  %v4789_v9 = vcombine.low %v7190_v10, %v4342_v40  ;;  %v4790_v47 = vcombine.high %v7190_v10, %v4342_v40 }
 0x7b1   :  { %5188 = vst.msk [vmem:[%s7386_s6 + $0x1a0] sm:$0xff] %vm1524_vm1, %v4767_v6  ;;  %5190 = vst.msk [vmem:[%s7386_s6 + $0x1b0] sm:$0xff] %vm1524_vm1, %v4768_v12  ;;  %v4774_v36 = vcombine.high %v7124_v3, %v4336_v30  ;;  %v4525_v53 = vrot.slane %v4517_v57, %v6174_v13  ;;  %v4532_v37 = vrot.slane %v4518_v58, %v6174_v13 }
 0x7b2   :  { %5192 = vst.msk [vmem:[%s7386_s6 + $0x1c0] sm:$0xff] %vm1524_vm1, %v4769_v2  ;;  %5194 = vst.msk [vmem:[%s7386_s6 + $0x1d0] sm:$0xff] %vm1524_vm1, %v4770_v62  ;;  %v4509_v34 = vrot.slane %v4501_v50, %v6174_v13  ;;  %v4797_v8 = vrot.slane %v4789_v9, %v6174_v13  ;;  %v4516_v48 = vrot.slane %v4502_v28, %v6174_v13 }
 0x7b3   :  { %5196 = vst.msk [vmem:[%s7386_s6 + $0x1e0] sm:$0xff] %vm1524_vm1, %v4771_v23  ;;  %5198 = vst.msk [vmem:[%s7386_s6 + $0x1f0] sm:$0xff] %vm1524_vm1, %v4772_v29  ;;  %v4350_v19 = vpop.permute.xlu1 %4349  ;;  %v4354_v33 = vpop.permute.xlu0 %4353  ;;  %v7282_v32 = vrot.slane %v4790_v47, %v6174_v13  ;;  %v4781_v52 = vrot.slane %v4773_v44, %v6174_v13  ;;  %v4788_v3 = vrot.slane %v4774_v36, %v6174_v13 }
 0x7b4   :  { %v4565_v49 = vcombine.low %v4509_v34, %v4525_v53  ;;  %v4566_v1 = vcombine.high %v4509_v34, %v4525_v53  ;;  %v4581_v16 = vcombine.low %v4516_v48, %v4532_v37  ;;  %v4582_v27 = vcombine.high %v4516_v48, %v4532_v37 }
 0x7b5   :  { %v4837_v17 = vcombine.low %v4781_v52, %v4797_v8  ;;  %v4838_v39 = vcombine.high %v4781_v52, %v4797_v8  ;;  %v4853_v10 = vcombine.low %v4788_v3, %v7282_v32  ;;  %v4854_v63 = vcombine.high %v4788_v3, %v7282_v32 }
 0x7b6   :  { %v4533_v43 = vcombine.low %v7135_v31, %v4354_v33  ;;  %v4534_v38 = vcombine.high %v7135_v31, %v4354_v33  ;;  %v4573_v61 = vrot.slane %v4565_v49, %v6209_v35  ;;  %v4580_v20 = vrot.slane %v4566_v1, %v6209_v35 }
 0x7b7   :  { %v4356_v59 = vpop.permute.xlu1 %4355  ;;  %v4360_v51 = vpop.permute.xlu0 %4359  ;;  %v4589_v5 = vrot.slane %v4581_v16, %v6209_v35  ;;  %v4596_v15 = vrot.slane %v4582_v27, %v6209_v35  ;;  %v4845_v30 = vrot.slane %v4837_v17, %v6209_v35  ;;  %v4852_v26 = vrot.slane %v4838_v39, %v6209_v35 }
 0x7b8   :  { %v4549_v14 = vcombine.low %v4348_v11, %v4360_v51  ;;  %v4550_v55 = vcombine.high %v4348_v11, %v4360_v51  ;;  %v4805_v45 = vcombine.low %v7142_v25, %v4356_v59  ;;  %v4806_v21 = vcombine.high %v7142_v25, %v4356_v59 }
 0x7b9   :  { %v4541_v7 = vrot.slane %v4533_v43, %v6174_v13  ;;  %v4548_v4 = vrot.slane %v4534_v38, %v6174_v13  ;;  %v4868_v33 = vrot.slane %v4854_v63, %v6209_v35 }
 0x7ba   :  { %v4557_v31 = vrot.slane %v4549_v14, %v6174_v13  ;;  %v4564_v41 = vrot.slane %v4550_v55, %v6174_v13  ;;  %v4813_v25 = vrot.slane %v4805_v45, %v6174_v13  ;;  %v4820_v50 = vrot.slane %v4806_v21, %v6174_v13 }
 0x7bb   :  { %v4362_v54 = vpop.permute.xlu1 %4361 }
 0x7bc   :  { %v4821_v46 = vcombine.low %v4350_v19, %v4362_v54  ;;  %v4822_v24 = vcombine.high %v4350_v19, %v4362_v54  ;;  %v4597_v60 = vcombine.low %v4541_v7, %v4557_v31  ;;  %v4598_v42 = vcombine.high %v4541_v7, %v4557_v31 }
 0x7bd   :  { %v4613_v0 = vcombine.low %v4548_v4, %v4564_v41  ;;  %v4614_v56 = vcombine.high %v4548_v4, %v4564_v41  ;;  %v4861_v19 = vrot.slane %v4853_v10, %v6209_v35 }
 0x7be   :  { %v4829_v18 = vrot.slane %v4821_v46, %v6174_v13  ;;  %v4836_v22 = vrot.slane %v4822_v24, %v6174_v13  ;;  %v4605_v6 = vrot.slane %v4597_v60, %v6209_v35  ;;  %v4612_v12 = vrot.slane %v4598_v42, %v6209_v35 }
 0x7bf   :  { %v4621_v2 = vrot.slane %v4613_v0, %v6209_v35  ;;  %v4628_v62 = vrot.slane %v4614_v56, %v6209_v35 }
 0x7c0   :  { %v4869_v23 = vcombine.low %v4813_v25, %v4829_v18  ;;  %v4870_v29 = vcombine.high %v4813_v25, %v4829_v18  ;;  %v4885_v40 = vcombine.low %v4820_v50, %v4836_v22  ;;  %v4886_v11 = vcombine.high %v4820_v50, %v4836_v22 }
 0x7c1   :  { %v4629_v28 = vcombine.low %v4573_v61, %v4605_v6  ;;  %v4630_v57 = vcombine.high %v4573_v61, %v4605_v6  ;;  %v4631_v58 = vcombine.low %v4580_v20, %v4612_v12  ;;  %v4632_v44 = vcombine.high %v4580_v20, %v4612_v12 }
 0x7c2   :  { %v4633_v9 = vcombine.low %v4589_v5, %v4621_v2  ;;  %v4634_v47 = vcombine.high %v4589_v5, %v4621_v2  ;;  %v4635_v36 = vcombine.low %v4596_v15, %v4628_v62  ;;  %v4636_v13 = vcombine.high %v4596_v15, %v4628_v62 }
 0x7c3   :  { %5169 = vst.msk [vmem:[%s7386_s6 + $0x108] sm:$0xff] %vm1524_vm1, %v4629_v28  ;;  %5171 = vst.msk [vmem:[%s7386_s6 + $0x118] sm:$0xff] %vm1524_vm1, %v4630_v57  ;;  %v4877_v53 = vrot.slane %v4869_v23, %v6209_v35  ;;  %v4884_v37 = vrot.slane %v4870_v29, %v6209_v35  ;;  %v4893_v34 = vrot.slane %v4885_v40, %v6209_v35 }
 0x7c4   :  { %5173 = vst.msk [vmem:[%s7386_s6 + $0x128] sm:$0xff] %vm1524_vm1, %v4631_v58  ;;  %5175 = vst.msk [vmem:[%s7386_s6 + $0x138] sm:$0xff] %vm1524_vm1, %v4632_v44  ;;  %v4900_v8 = vrot.slane %v4886_v11, %v6209_v35 }
 0x7c5   :  { %5177 = vst.msk [vmem:[%s7386_s6 + $0x148] sm:$0xff] %vm1524_vm1, %v4633_v9  ;;  %5179 = vst.msk [vmem:[%s7386_s6 + $0x158] sm:$0xff] %vm1524_vm1, %v4634_v47  ;;  %v4901_v35 = vcombine.low %v4845_v30, %v4877_v53  ;;  %v4902_v48 = vcombine.high %v4845_v30, %v4877_v53  ;;  %v4903_v32 = vcombine.low %v4852_v26, %v4884_v37 }
 0x7c6   :  { %5181 = vst.msk [vmem:[%s7386_s6 + $0x168] sm:$0xff] %vm1524_vm1, %v4635_v36  ;;  %5183 = vst.msk [vmem:[%s7386_s6 + $0x178] sm:$0xff] %vm1524_vm1, %v4636_v13  ;;  %v4904_v52 = vcombine.high %v4852_v26, %v4884_v37  ;;  %v4905_v49 = vcombine.low %v4861_v19, %v4893_v34  ;;  %v4906_v1 = vcombine.high %v4861_v19, %v4893_v34 }
 0x7c7   :  { %v4907_v3 = vcombine.low %v4868_v33, %v4900_v8  ;;  %v4908_v16 = vcombine.high %v4868_v33, %v4900_v8  ;;  %5185 = vst.msk [vmem:[%s7386_s6 + $0x188] sm:$0xff] %vm1524_vm1, %v4901_v35  ;;  %5187 = vst.msk [vmem:[%s7386_s6 + $0x198] sm:$0xff] %vm1524_vm1, %v4902_v48 }
 0x7c8   :  { %5189 = vst.msk [vmem:[%s7386_s6 + $0x1a8] sm:$0xff] %vm1524_vm1, %v4903_v32  ;;  %5191 = vst.msk [vmem:[%s7386_s6 + $0x1b8] sm:$0xff] %vm1524_vm1, %v4904_v52 }
 0x7c9   :  { %5193 = vst.msk [vmem:[%s7386_s6 + $0x1c8] sm:$0xff] %vm1524_vm1, %v4905_v49  ;;  %5195 = vst.msk [vmem:[%s7386_s6 + $0x1d8] sm:$0xff] %vm1524_vm1, %v4906_v1 }
 0x7ca   :  { %5197 = vst.msk [vmem:[%s7386_s6 + $0x1e8] sm:$0xff] %vm1524_vm1, %v4907_v3  ;;  %5199 = vst.msk [vmem:[%s7386_s6 + $0x1f8] sm:$0xff] %vm1524_vm1, %v4908_v16 }

</bundles_post_ra>
